<compile_context>
chip_gen: v7x
topology: tpu7x:2x2x1
jax: 0.10.0
libtpu: 0.0.40
codegen_flags: <defaults>
</compile_context>

<pallas_src>
import jax
import jax.numpy as jnp
from jax.experimental import pallas as pl
from jax.experimental.pallas import tpu as pltpu

N_CLASSES = 10
HIDDEN_SIZES = (512, 128, 64)
LANE = 128
TILE_B_MAX = 1024                       # per-tile rows; safe on v5e/v6e/v7x
VMEM_LIMIT_BYTES = 32 * 1024 * 1024     # within every generation's budget


def _cdiv(a, b):
    return (a + b - 1) // b


def _round_up(x, m):
    return _cdiv(x, m) * m


def _pad2d(a, rows, cols):
    return jnp.pad(a, ((0, rows - a.shape[0]), (0, cols - a.shape[1])))


def _mlp_kernel(x_ref, w1_ref, b1_ref, w2_ref, b2_ref, w3_ref, b3_ref,
                w4_ref, b4_ref, out_ref):
    """4-layer MLP (Linear+ReLU x3, final Linear) on one batch tile.

    x arrives f32 straight from HBM and is cast to bf16 on the VPU here;
    weights are pre-cast bf16, biases f32, accumulation f32 on the MXU.
    """
    x = x_ref[...].astype(jnp.bfloat16)

    h = jnp.dot(x, w1_ref[...], preferred_element_type=jnp.float32) + b1_ref[...]
    h = jnp.maximum(h, 0.0).astype(jnp.bfloat16)

    h = jnp.dot(h, w2_ref[...], preferred_element_type=jnp.float32) + b2_ref[...]
    h = jnp.maximum(h, 0.0).astype(jnp.bfloat16)

    h = jnp.dot(h, w3_ref[...], preferred_element_type=jnp.float32) + b3_ref[...]
    h = jnp.maximum(h, 0.0).astype(jnp.bfloat16)

    logits = jnp.dot(h, w4_ref[...], preferred_element_type=jnp.float32) + b4_ref[...]
    out_ref[...] = logits.astype(out_ref.dtype)


def init_params(key, input_size, n_classes=N_CLASSES):
    """Deterministic PyTorch-style init: U(-1/sqrt(fan_in), 1/sqrt(fan_in))."""
    dims = (input_size,) + HIDDEN_SIZES + (n_classes,)
    params = []
    for i in range(len(dims) - 1):
        fan_in, fan_out = dims[i], dims[i + 1]
        key, wk, bk = jax.random.split(key, 3)
        bound = 1.0 / (fan_in ** 0.5)
        w = jax.random.uniform(wk, (fan_in, fan_out), jnp.float32, -bound, bound)
        b = jax.random.uniform(bk, (fan_out,), jnp.float32, -bound, bound)
        params.append((w, b))
    return params


def prepare_params(params):
    """One-time param prep: pad weight K/N dims to 128-lane multiples, cast
    weights to bf16, reshape biases to (1, N) f32.

    Call once at model-load time and reuse; keeps the per-step wrapper free of
    weight re-pad / re-cast traffic. Zero-padding is semantically neutral:
    padded hidden columns get 0 bias, stay 0 through ReLU, and multiply into
    zero rows of the next weight; padded output columns are sliced off.
    """
    (w1, b1), (w2, b2), (w3, b3), (w4, b4) = params
    h1 = w1.shape[1]                        # 512 (already lane-aligned)
    h2p = _round_up(w2.shape[1], LANE)      # 128
    h3p = _round_up(w3.shape[1], LANE)      # 64  -> 128
    outp = _round_up(w4.shape[1], LANE)     # 10  -> 128

    w1p = w1.astype(jnp.bfloat16)                               # (d_in, 512)
    w2p = _pad2d(w2, h1, h2p).astype(jnp.bfloat16)              # (512, 128)
    w3p = _pad2d(w3, w3.shape[0], h3p).astype(jnp.bfloat16)     # (128, 128)
    w4p = _pad2d(w4, h3p, outp).astype(jnp.bfloat16)            # (128, 128)

    b1p = b1.reshape(1, -1).astype(jnp.float32)
    b2p = jnp.pad(b2, (0, h2p - b2.shape[0])).reshape(1, -1).astype(jnp.float32)
    b3p = jnp.pad(b3, (0, h3p - b3.shape[0])).reshape(1, -1).astype(jnp.float32)
    b4p = jnp.pad(b4, (0, outp - b4.shape[0])).reshape(1, -1).astype(jnp.float32)
    return (w1p, b1p, w2p, b2p, w3p, b3p, w4p, b4p)


def mnist_mlp_forward(x, prepped, n_out=N_CLASSES):
    """x: (B, C, H, W) float32; prepped = prepare_params(params).
    Returns logits (B, n_out) float32."""
    w1p, b1p, w2p, b2p, w3p, b3p, w4p, b4p = prepped

    B = x.shape[0]
    x_flat = x.reshape(B, -1).astype(jnp.float32)    # nn.Flatten (wrapper glue)
    d_in = x_flat.shape[1]
    assert d_in == w1p.shape[0], "input_size mismatch vs. prepared params"
    out_p = w4p.shape[1]

    # Batch tiling: cap padding waste at <128 rows per tile, and keep >=2 grid
    # steps once B >= 256 so the parallel batch axis can shard across both
    # v7x TensorCores.
    n_tiles = _cdiv(_round_up(B, LANE), TILE_B_MAX)
    if B >= 256:
        n_tiles = max(n_tiles, 2)
    tile_b = _round_up(_cdiv(B, n_tiles), LANE)
    b_pad = n_tiles * tile_b

    # Only the batch dim is padded (f32, feature dim untouched); padded rows
    # are zero and their logits are sliced off below. No bf16 copy of x is
    # materialized here — the cast happens in-kernel.
    xp = jnp.pad(x_flat, ((0, b_pad - B), (0, 0)))

    def resident(shape):
        # Same block index every grid step -> stays VMEM-resident across the
        # batch loop instead of being re-fetched per tile.
        return pl.BlockSpec(shape, lambda i: (0, 0))

    flops = 2 * b_pad * (d_in * w1p.shape[1]
                         + w1p.shape[1] * w2p.shape[1]
                         + w2p.shape[1] * w3p.shape[1]
                         + w3p.shape[1] * out_p)
    bytes_accessed = (xp.size * 4
                      + sum(a.size * a.dtype.itemsize
                            for a in (w1p, w2p, w3p, w4p, b1p, b2p, b3p, b4p))
                      + b_pad * out_p * 2)

    out_padded = pl.pallas_call(
        _mlp_kernel,
        out_shape=jax.ShapeDtypeStruct((b_pad, out_p), jnp.bfloat16),
        grid=(n_tiles,),
        in_specs=[
            # x: (tile_b, d_in); last dim = full array dim (legal), f32 stream.
            pl.BlockSpec((tile_b, d_in), lambda i: (i, 0)),
            resident(w1p.shape), resident(b1p.shape),
            resident(w2p.shape), resident(b2p.shape),
            resident(w3p.shape), resident(b3p.shape),
            resident(w4p.shape), resident(b4p.shape),
        ],
        out_specs=pl.BlockSpec((tile_b, out_p), lambda i: (i, 0)),
        compiler_params=pltpu.CompilerParams(
            dimension_semantics=("parallel",),
            vmem_limit_bytes=VMEM_LIMIT_BYTES),
        cost_estimate=pl.CostEstimate(
            flops=flops, transcendentals=0, bytes_accessed=bytes_accessed),
    )(xp, w1p, b1p, w2p, b2p, w3p, b3p, w4p, b4p)

    return out_padded[:B, :n_out].astype(jnp.float32)


def reference_forward(x, params):
    """Pure-JAX f32 reference for correctness check."""
    h = x.reshape(x.shape[0], -1).astype(jnp.float32)
    for i, (w, b) in enumerate(params):
        h = h @ w + b
        if i < len(params) - 1:
            h = jnp.maximum(h, 0.0)
    return h


if __name__ == "__main__":
    key = jax.random.PRNGKey(0)
    k_x, k_p = jax.random.split(key)

    # Small MNIST-like input: batch=2, 1 channel, 16x16 spatial -> input_size=256.
    B, C, H, W = 2, 1, 16, 16
    x = jax.random.normal(k_x, (B, C, H, W), dtype=jnp.float32)

    params = init_params(k_p, input_size=C * H * W, n_classes=N_CLASSES)
    prepped = prepare_params(params)          # one-time padded/bf16 weights

    fwd = jax.jit(mnist_mlp_forward)
    logits = jax.block_until_ready(fwd(x, prepped))

    ref = reference_forward(x, params)
    assert logits.shape == (B, N_CLASSES)
    # bf16 weights/activations/logits with f32 accumulation -> relaxed tolerance.
    assert jnp.allclose(logits, ref, atol=5e-2, rtol=5e-2), "mismatch vs reference"

    print("KERNEL_OK")
</pallas_src>

<mosaic_0001>
module attributes {stable_mosaic.version = 11 : i64} {
  func.func @_mlp_kernel(%arg0: i32, %arg1: memref<128x256xf32, #tpu.memory_space<vmem>>, %arg2: memref<256x512xbf16, #tpu.memory_space<vmem>>, %arg3: memref<1x512xf32, #tpu.memory_space<vmem>>, %arg4: memref<512x128xbf16, #tpu.memory_space<vmem>>, %arg5: memref<1x128xf32, #tpu.memory_space<vmem>>, %arg6: memref<128x128xbf16, #tpu.memory_space<vmem>>, %arg7: memref<1x128xf32, #tpu.memory_space<vmem>>, %arg8: memref<128x128xbf16, #tpu.memory_space<vmem>>, %arg9: memref<1x128xf32, #tpu.memory_space<vmem>>, %arg10: memref<128x128xbf16, #tpu.memory_space<vmem>>) attributes {dimension_semantics = [#tpu.dimension_semantics<parallel>], iteration_bounds = array<i64: 1>, scalar_prefetch = 0 : i64, scratch_operands = 0 : i64, tpu.core_type = #tpu.core_type<tc>, window_params = [{transform_indices = @transform_0, window_bounds = array<i64: 128, 256>}, {pipeline_mode = #tpu.pipeline_mode<synchronous>, transform_indices = @transform_1, window_bounds = array<i64: 256, 512>}, {pipeline_mode = #tpu.pipeline_mode<synchronous>, transform_indices = @transform_2, window_bounds = array<i64: 1, 512>}, {pipeline_mode = #tpu.pipeline_mode<synchronous>, transform_indices = @transform_3, window_bounds = array<i64: 512, 128>}, {pipeline_mode = #tpu.pipeline_mode<synchronous>, transform_indices = @transform_4, window_bounds = array<i64: 1, 128>}, {pipeline_mode = #tpu.pipeline_mode<synchronous>, transform_indices = @transform_5, window_bounds = array<i64: 128, 128>}, {pipeline_mode = #tpu.pipeline_mode<synchronous>, transform_indices = @transform_6, window_bounds = array<i64: 1, 128>}, {pipeline_mode = #tpu.pipeline_mode<synchronous>, transform_indices = @transform_7, window_bounds = array<i64: 128, 128>}, {pipeline_mode = #tpu.pipeline_mode<synchronous>, transform_indices = @transform_8, window_bounds = array<i64: 1, 128>}, {transform_indices = @transform_9, window_bounds = array<i64: 128, 128>}]} {
    %c0 = arith.constant 0 : index
    %c0_0 = arith.constant 0 : index
    %0 = vector.load %arg1[%c0, %c0_0] : memref<128x256xf32, #tpu.memory_space<vmem>>, vector<128x256xf32>
    %1 = arith.truncf %0 : vector<128x256xf32> to vector<128x256xbf16>
    %c0_1 = arith.constant 0 : index
    %c0_2 = arith.constant 0 : index
    %2 = vector.load %arg2[%c0_1, %c0_2] : memref<256x512xbf16, #tpu.memory_space<vmem>>, vector<256x512xbf16>
    %cst = arith.constant dense<0.000000e+00> : vector<128x512xf32>
    %3 = tpu.matmul %1, %2, %cst {dimension_numbers = #tpu.dot_dimension_numbers<[1], [0], [0], [1], [0, 0, 1, 1], [], []>} : vector<128x256xbf16>, vector<256x512xbf16>, vector<128x512xf32> -> vector<128x512xf32>
    %c0_3 = arith.constant 0 : index
    %c0_4 = arith.constant 0 : index
    %4 = vector.load %arg3[%c0_3, %c0_4] : memref<1x512xf32, #tpu.memory_space<vmem>>, vector<1x512xf32>
    %5 = vector.broadcast %4 : vector<1x512xf32> to vector<128x512xf32>
    %6 = arith.addf %3, %5 : vector<128x512xf32>
    %cst_5 = arith.constant 0.000000e+00 : f32
    %7 = vector.broadcast %cst_5 : f32 to vector<128x512xf32>
    %8 = arith.maximumf %6, %7 : vector<128x512xf32>
    %9 = arith.truncf %8 : vector<128x512xf32> to vector<128x512xbf16>
    %c0_6 = arith.constant 0 : index
    %c0_7 = arith.constant 0 : index
    %10 = vector.load %arg4[%c0_6, %c0_7] : memref<512x128xbf16, #tpu.memory_space<vmem>>, vector<512x128xbf16>
    %cst_8 = arith.constant dense<0.000000e+00> : vector<128x128xf32>
    %11 = tpu.matmul %9, %10, %cst_8 {dimension_numbers = #tpu.dot_dimension_numbers<[1], [0], [0], [1], [0, 0, 1, 1], [], []>} : vector<128x512xbf16>, vector<512x128xbf16>, vector<128x128xf32> -> vector<128x128xf32>
    %c0_9 = arith.constant 0 : index
    %c0_10 = arith.constant 0 : index
    %12 = vector.load %arg5[%c0_9, %c0_10] : memref<1x128xf32, #tpu.memory_space<vmem>>, vector<1x128xf32>
    %13 = vector.broadcast %12 : vector<1x128xf32> to vector<128x128xf32>
    %14 = arith.addf %11, %13 : vector<128x128xf32>
    %cst_11 = arith.constant 0.000000e+00 : f32
    %15 = vector.broadcast %cst_11 : f32 to vector<128x128xf32>
    %16 = arith.maximumf %14, %15 : vector<128x128xf32>
    %17 = arith.truncf %16 : vector<128x128xf32> to vector<128x128xbf16>
    %c0_12 = arith.constant 0 : index
    %c0_13 = arith.constant 0 : index
    %18 = vector.load %arg6[%c0_12, %c0_13] : memref<128x128xbf16, #tpu.memory_space<vmem>>, vector<128x128xbf16>
    %cst_14 = arith.constant dense<0.000000e+00> : vector<128x128xf32>
    %19 = tpu.matmul %17, %18, %cst_14 {dimension_numbers = #tpu.dot_dimension_numbers<[1], [0], [0], [1], [0, 0, 1, 1], [], []>} : vector<128x128xbf16>, vector<128x128xbf16>, vector<128x128xf32> -> vector<128x128xf32>
    %c0_15 = arith.constant 0 : index
    %c0_16 = arith.constant 0 : index
    %20 = vector.load %arg7[%c0_15, %c0_16] : memref<1x128xf32, #tpu.memory_space<vmem>>, vector<1x128xf32>
    %21 = vector.broadcast %20 : vector<1x128xf32> to vector<128x128xf32>
    %22 = arith.addf %19, %21 : vector<128x128xf32>
    %cst_17 = arith.constant 0.000000e+00 : f32
    %23 = vector.broadcast %cst_17 : f32 to vector<128x128xf32>
    %24 = arith.maximumf %22, %23 : vector<128x128xf32>
    %25 = arith.truncf %24 : vector<128x128xf32> to vector<128x128xbf16>
    %c0_18 = arith.constant 0 : index
    %c0_19 = arith.constant 0 : index
    %26 = vector.load %arg8[%c0_18, %c0_19] : memref<128x128xbf16, #tpu.memory_space<vmem>>, vector<128x128xbf16>
    %cst_20 = arith.constant dense<0.000000e+00> : vector<128x128xf32>
    %27 = tpu.matmul %25, %26, %cst_20 {dimension_numbers = #tpu.dot_dimension_numbers<[1], [0], [0], [1], [0, 0, 1, 1], [], []>} : vector<128x128xbf16>, vector<128x128xbf16>, vector<128x128xf32> -> vector<128x128xf32>
    %c0_21 = arith.constant 0 : index
    %c0_22 = arith.constant 0 : index
    %28 = vector.load %arg9[%c0_21, %c0_22] : memref<1x128xf32, #tpu.memory_space<vmem>>, vector<1x128xf32>
    %29 = vector.broadcast %28 : vector<1x128xf32> to vector<128x128xf32>
    %30 = arith.addf %27, %29 : vector<128x128xf32>
    %31 = arith.truncf %30 : vector<128x128xf32> to vector<128x128xbf16>
    %c0_23 = arith.constant 0 : index
    %c0_24 = arith.constant 0 : index
    %32 = vector.load %arg10[%c0_23, %c0_24] : memref<128x128xbf16, #tpu.memory_space<vmem>>, vector<128x128xbf16>
    tpu.vector_store %arg10[%c0_23, %c0_24], %31 {strides = array<i32>} : memref<128x128xbf16, #tpu.memory_space<vmem>>, vector<128x128xbf16>,
    return
  }
  func.func @transform_0(%arg0: i32) -> (i32, i32) {
    %c0_i32 = arith.constant 0 : i32
    %c0_i32_0 = arith.constant 0 : i32
    return %arg0, %c0_i32 : i32, i32
  }
  func.func @transform_1(%arg0: i32) -> (i32, i32) {
    %c0_i32 = arith.constant 0 : i32
    %c0_i32_0 = arith.constant 0 : i32
    %c0_i32_1 = arith.constant 0 : i32
    return %c0_i32, %c0_i32_0 : i32, i32
  }
  func.func @transform_2(%arg0: i32) -> (i32, i32) {
    %c0_i32 = arith.constant 0 : i32
    %c0_i32_0 = arith.constant 0 : i32
    %c0_i32_1 = arith.constant 0 : i32
    return %c0_i32, %c0_i32_0 : i32, i32
  }
  func.func @transform_3(%arg0: i32) -> (i32, i32) {
    %c0_i32 = arith.constant 0 : i32
    %c0_i32_0 = arith.constant 0 : i32
    %c0_i32_1 = arith.constant 0 : i32
    return %c0_i32, %c0_i32_0 : i32, i32
  }
  func.func @transform_4(%arg0: i32) -> (i32, i32) {
    %c0_i32 = arith.constant 0 : i32
    %c0_i32_0 = arith.constant 0 : i32
    %c0_i32_1 = arith.constant 0 : i32
    return %c0_i32, %c0_i32_0 : i32, i32
  }
  func.func @transform_5(%arg0: i32) -> (i32, i32) {
    %c0_i32 = arith.constant 0 : i32
    %c0_i32_0 = arith.constant 0 : i32
    %c0_i32_1 = arith.constant 0 : i32
    return %c0_i32, %c0_i32_0 : i32, i32
  }
  func.func @transform_6(%arg0: i32) -> (i32, i32) {
    %c0_i32 = arith.constant 0 : i32
    %c0_i32_0 = arith.constant 0 : i32
    %c0_i32_1 = arith.constant 0 : i32
    return %c0_i32, %c0_i32_0 : i32, i32
  }
  func.func @transform_7(%arg0: i32) -> (i32, i32) {
    %c0_i32 = arith.constant 0 : i32
    %c0_i32_0 = arith.constant 0 : i32
    %c0_i32_1 = arith.constant 0 : i32
    return %c0_i32, %c0_i32_0 : i32, i32
  }
  func.func @transform_8(%arg0: i32) -> (i32, i32) {
    %c0_i32 = arith.constant 0 : i32
    %c0_i32_0 = arith.constant 0 : i32
    %c0_i32_1 = arith.constant 0 : i32
    return %c0_i32, %c0_i32_0 : i32, i32
  }
  func.func @transform_9(%arg0: i32) -> (i32, i32) {
    %c0_i32 = arith.constant 0 : i32
    %c0_i32_0 = arith.constant 0 : i32
    return %arg0, %c0_i32 : i32, i32
  }
}

</mosaic_0001>

<bundles_post_ra>
// kernel: mnist_mlp_forward.1
= control target key start
LH: loop header
LB: loop body
LE: loop exit
PB: predicated region body
PF: predicated region fallthrough
CT: control target
= control target key end

     0   :  { %14 = vsyncpa [#allocation3], 0  ;;  %s2857_s0 = inlined_call_operand.vmem [shape: f32[128,256], index: 0, kind: input, shape index: {}]   ;;  %s2858_s1 = inlined_call_operand.hbm [shape: bf16[256,512], index: 1, kind: input, shape index: {}]   ;;  %s2859_s2 = inlined_call_operand.hbm [shape: f32[1,512], index: 2, kind: input, shape index: {}]   ;;  %s2860_s3 = inlined_call_operand.vmem [shape: bf16[512,128], index: 3, kind: input, shape index: {}]   ;;  %s2861_s4 = inlined_call_operand.vmem [shape: f32[1,128], index: 4, kind: input, shape index: {}]   ;;  %s2862_s5 = inlined_call_operand.hbm [shape: bf16[128,128], index: 5, kind: input, shape index: {}]   ;;  %s2863_s6 = inlined_call_operand.vmem [shape: f32[1,128], index: 6, kind: input, shape index: {}]   ;;  %s2864_s7 = inlined_call_operand.vmem [shape: bf16[128,128], index: 7, kind: input, shape index: {}]   ;;  %s2865_s8 = inlined_call_operand.vmem [shape: f32[1,128], index: 8, kind: input, shape index: {}]   ;;  %s2866_s9 = inlined_call_operand.vmem [shape: bf16[128,128], index: 9, kind: output, shape index: {}]  }
   0x1   :  { %15 = vsyncpa [#allocation5], 0  ;;  %s2414_s30 = smov [#allocation4]   ;;  %s2415_s11 = smov [#allocation2]  }
   0x2   :  { %s36_s10 = sshll.u32 %s2414_s30, 4  ;;  %s23_s12 = sshll.u32 %s2415_s11, 4  ;;  %s37_s10 = int_to_ptr.vmem [resolvable:$true] %s36_s10  ;;  %s2471_s12 = int_to_ptr.vmem [resolvable:$true] %s23_s12 }
   0x3   :  { %s2344_s15 = scalar_lea.hbm %s2859_s2, 64 }
   0x4   :  { %p2345_p0 = scmp.ne.s32.totalorder %s2859_s2, %s2344_s15  ;;  %p2348_p1 = scmp.lt.u32.totalorder %s2344_s15, %s2859_s2 }
   0x6   :  { %p2350_p2 = pnand %p2348_p1, %p2345_p0 }
   0x8   :  { %2353 = shalt.err (!%p2350_p2)
}
   0x9   :  { %s2354_s20 = scalar_lea.vmem %s37_s10, 64  ;;  %p2359_p4 = scmp.lt.s32.totalorder %s37_s10, %s37_s10 }
   0xa   :  { %p2355_p3 = scmp.ne.s32.totalorder %s37_s10, %s2354_s20  ;;  %p2360_p5 = scmp.lt.s32.totalorder %s2354_s20, %s2354_s20 }
   0xc   :  { %p2361_p6 = por %p2360_p5, %p2359_p4 }
   0xe   :  { %p2362_p7 = pnand %p2361_p6, %p2355_p3 }
  0x10   :  { %2365 = shalt.err (!%p2362_p7)
}
  0x11   :  { %39 = dma.hbm_to_vmem [thread:$0]  %s2859_s2, 64, %s37_s10, [#allocation5]  }
  0x12   :  { %s2366_s25 = scalar_lea.hbm %s2858_s1, 8192 }
  0x13   :  { %p2367_p8 = scmp.ne.s32.totalorder %s2858_s1, %s2366_s25  ;;  %p2370_p9 = scmp.lt.u32.totalorder %s2366_s25, %s2858_s1 }
  0x15   :  { %p2372_p10 = pnand %p2370_p9, %p2367_p8 }
  0x17   :  { %2375 = shalt.err (!%p2372_p10)
}
  0x18   :  { %s2376_s30 = scalar_lea.vmem %s2471_s12, 8192  ;;  %p2381_p12 = scmp.lt.s32.totalorder %s2471_s12, %s2471_s12 }
  0x19   :  { %p2377_p11 = scmp.ne.s32.totalorder %s2471_s12, %s2376_s30  ;;  %p2382_p13 = scmp.lt.s32.totalorder %s2376_s30, %s2376_s30 }
  0x1b   :  { %p2383_p0 = por %p2382_p13, %p2381_p12 }
  0x1d   :  { %p2384_p1 = pnand %p2383_p0, %p2377_p11 }
  0x1f   :  { %2387 = shalt.err (!%p2384_p1)
}
  0x20   :  { %s2416_s2 = smov 256   ;;  %s2417_s10 = smov 16  }
  0x21   :  { %29 = dma.hbm_to_vmem [thread:$0]  %s2858_s1, 8192, %s2471_s12, [#allocation3], %s2416_s2, %s2416_s2, %s2417_s10  }
  0x22   :  { %s2418_s14 = smov [#allocation6]   ;;  %s2388_s18 = scalar_lea.hbm %s2862_s5, 1024 }
  0x23   :  { %s49_s15 = sshll.u32 %s2418_s14, 4  ;;  %p2389_p2 = scmp.ne.s32.totalorder %s2862_s5, %s2388_s18  ;;  %s50_s15 = int_to_ptr.vmem [resolvable:$true] %s49_s15 }
  0x24   :  { %p2392_p3 = scmp.lt.u32.totalorder %s2388_s18, %s2862_s5 }
  0x26   :  { %p2394_p4 = pnand %p2392_p3, %p2389_p2 }
  0x28   :  { %2397 = shalt.err (!%p2394_p4)
}
  0x29   :  { %s2398_s23 = scalar_lea.vmem %s50_s15, 1024  ;;  %p2403_p6 = scmp.lt.s32.totalorder %s50_s15, %s50_s15 }
  0x2a   :  { %p2399_p5 = scmp.ne.s32.totalorder %s50_s15, %s2398_s23  ;;  %p2404_p7 = scmp.lt.s32.totalorder %s2398_s23, %s2398_s23 }
  0x2c   :  { %p2405_p8 = por %p2404_p7, %p2403_p6 }
  0x2e   :  { %p2406_p9 = pnand %p2405_p8, %p2399_p5 }
  0x30   :  { %2409 = shalt.err (!%p2406_p9)
}
  0x31   :  { %s2419_s1 = smov 64   ;;  %s2420_s12 = smov 4  }
  0x32   :  { %55 = dma.hbm_to_vmem [thread:$0]  %s2862_s5, 1024, %s50_s15, [#allocation5], %s2419_s1, %s2419_s1, %s2420_s12  }
  0x33   :  { %2410 = dma.done.wait [#allocation3], 8192  }
  0x34   :  { %2411 = vsyncadd [#allocation3], 4294959104 }
  0x35   :  { %2412 = dma.done.wait [#allocation5], 1088  }
  0x36   :  { %2413 = vsyncadd [#allocation5], 4294966208  ;;  %v2200_v0 = vld [vmem:[#allocation2 + $0x4] ss:$16 sps:$4 sm:$0xff]   ;;  %v2202_v1 = vld [vmem:[#allocation2 + $0xc] ss:$16 sps:$4 sm:$0xff]  }
  0x37   :  { %526 = vmatprep.subr.bf16.mxu0 %v2200_v0  ;;  %v2204_v2 = vld [vmem:[#allocation2] ss:$16 sps:$4 sm:$0xff]   ;;  %v2205_v3 = vld [vmem:[#allocation2 + $0x8] ss:$16 sps:$4 sm:$0xff]   ;;  %639 = vmatprep.subr.bf16.mxu1 %v2202_v1  ;;  %v2206_v4 = vld [vmem:[#allocation2 + $0x24] ss:$16 sps:$4 sm:$0xff]  }
  0x38   :  { %527 = vmatpush1.bf16.msra.mxu0 %v2204_v2  ;;  %640 = vmatpush1.bf16.msra.mxu1 %v2205_v3  ;;  %v2208_v5 = vld [vmem:[#allocation2 + $0x2c] ss:$16 sps:$4 sm:$0xff]   ;;  %v2210_v6 = vld [vmem:[#allocation2 + $0x20] ss:$16 sps:$4 sm:$0xff]   ;;  %v2211_v7 = vld [vmem:[#allocation2 + $0x28] ss:$16 sps:$4 sm:$0xff]  }
  0x39   :  { %528 = vmatprep.subr.bf16.mxu0 %v2206_v4  ;;  %641 = vmatprep.subr.bf16.mxu1 %v2208_v5  ;;  %v2212_v8 = vld [vmem:[#allocation2 + $0x44] ss:$16 sps:$4 sm:$0xff]   ;;  %v2214_v9 = vld [vmem:[#allocation2 + $0x4c] ss:$16 sps:$4 sm:$0xff]   ;;  %v2216_v10 = vld [vmem:[#allocation2 + $0x40] ss:$16 sps:$4 sm:$0xff]  }
  0x3a   :  { %v2217_v11 = vld [vmem:[#allocation2 + $0x48] ss:$16 sps:$4 sm:$0xff]   ;;  %v2218_v12 = vld [vmem:[#allocation2 + $0x64] ss:$16 sps:$4 sm:$0xff]   ;;  %v2220_v13 = vld [vmem:[#allocation2 + $0x6c] ss:$16 sps:$4 sm:$0xff]  }
  0x3b   :  { %v2222_v14 = vld [vmem:[#allocation2 + $0x60] ss:$16 sps:$4 sm:$0xff]   ;;  %v2223_v15 = vld [vmem:[#allocation2 + $0x68] ss:$16 sps:$4 sm:$0xff]   ;;  %v2224_v16 = vld [vmem:[#allocation2 + $0x84] ss:$16 sps:$4 sm:$0xff]  }
  0x3c   :  { %529 = vmatpush1.bf16.msra.mxu0 %v2210_v6  ;;  %642 = vmatpush1.bf16.msra.mxu1 %v2211_v7  ;;  %v2226_v17 = vld [vmem:[#allocation2 + $0x8c] ss:$16 sps:$4 sm:$0xff]   ;;  %v2228_v18 = vld [vmem:[#allocation2 + $0x80] ss:$16 sps:$4 sm:$0xff]   ;;  %v2229_v19 = vld [vmem:[#allocation2 + $0x88] ss:$16 sps:$4 sm:$0xff]  }
  0x3d   :  { %530 = vmatprep.subr.bf16.mxu0 %v2212_v8  ;;  %643 = vmatprep.subr.bf16.mxu1 %v2214_v9  ;;  %v2230_v20 = vld [vmem:[#allocation2 + $0xa4] ss:$16 sps:$4 sm:$0xff]   ;;  %v2232_v21 = vld [vmem:[#allocation2 + $0xac] ss:$16 sps:$4 sm:$0xff]   ;;  %v2234_v22 = vld [vmem:[#allocation2 + $0xa0] ss:$16 sps:$4 sm:$0xff]  }
  0x3e   :  { %v2235_v23 = vld [vmem:[#allocation2 + $0xa8] ss:$16 sps:$4 sm:$0xff]   ;;  %v2236_v24 = vld [vmem:[#allocation2 + $0xc4] ss:$16 sps:$4 sm:$0xff]   ;;  %v2238_v25 = vld [vmem:[#allocation2 + $0xcc] ss:$16 sps:$4 sm:$0xff]  }
  0x3f   :  { %v2240_v26 = vld [vmem:[#allocation2 + $0xc0] ss:$16 sps:$4 sm:$0xff]   ;;  %v2241_v27 = vld [vmem:[#allocation2 + $0xc8] ss:$16 sps:$4 sm:$0xff]   ;;  %v2242_v28 = vld [vmem:[#allocation2 + $0xe4] ss:$16 sps:$4 sm:$0xff]  }
  0x40   :  { %531 = vmatpush1.bf16.msra.mxu0 %v2216_v10  ;;  %644 = vmatpush1.bf16.msra.mxu1 %v2217_v11  ;;  %v2244_v29 = vld [vmem:[#allocation2 + $0xec] ss:$16 sps:$4 sm:$0xff]   ;;  %v2246_v30 = vld [vmem:[#allocation2 + $0xe0] ss:$16 sps:$4 sm:$0xff]   ;;  %v2247_v31 = vld [vmem:[#allocation2 + $0xe8] ss:$16 sps:$4 sm:$0xff]  }
  0x41   :  { %532 = vmatprep.subr.bf16.mxu0 %v2218_v12  ;;  %645 = vmatprep.subr.bf16.mxu1 %v2220_v13  ;;  %v2248_v32 = vld [vmem:[#allocation2 + $0x104] ss:$16 sps:$4 sm:$0xff]   ;;  %v2250_v33 = vld [vmem:[#allocation2 + $0x10c] ss:$16 sps:$4 sm:$0xff]   ;;  %v2252_v34 = vld [vmem:[#allocation2 + $0x100] ss:$16 sps:$4 sm:$0xff]  }
  0x42   :  { %v2253_v35 = vld [vmem:[#allocation2 + $0x108] ss:$16 sps:$4 sm:$0xff]   ;;  %v2254_v36 = vld [vmem:[#allocation2 + $0x124] ss:$16 sps:$4 sm:$0xff]   ;;  %v2256_v37 = vld [vmem:[#allocation2 + $0x12c] ss:$16 sps:$4 sm:$0xff]  }
  0x43   :  { %v2258_v38 = vld [vmem:[#allocation2 + $0x120] ss:$16 sps:$4 sm:$0xff]   ;;  %v2259_v39 = vld [vmem:[#allocation2 + $0x128] ss:$16 sps:$4 sm:$0xff]   ;;  %v2260_v40 = vld [vmem:[#allocation2 + $0x144] ss:$16 sps:$4 sm:$0xff]  }
  0x44   :  { %533 = vmatpush1.bf16.msra.mxu0 %v2222_v14  ;;  %646 = vmatpush1.bf16.msra.mxu1 %v2223_v15  ;;  %v2262_v41 = vld [vmem:[#allocation2 + $0x14c] ss:$16 sps:$4 sm:$0xff]   ;;  %v2264_v42 = vld [vmem:[#allocation2 + $0x140] ss:$16 sps:$4 sm:$0xff]   ;;  %v2265_v43 = vld [vmem:[#allocation2 + $0x148] ss:$16 sps:$4 sm:$0xff]  }
  0x45   :  { %534 = vmatprep.subr.bf16.mxu0 %v2224_v16  ;;  %647 = vmatprep.subr.bf16.mxu1 %v2226_v17  ;;  %v2266_v44 = vld [vmem:[#allocation2 + $0x164] ss:$16 sps:$4 sm:$0xff]   ;;  %v2268_v45 = vld [vmem:[#allocation2 + $0x16c] ss:$16 sps:$4 sm:$0xff]   ;;  %v2270_v48 = vld [vmem:[#allocation2 + $0x160] ss:$16 sps:$4 sm:$0xff]  }
  0x46   :  { %v73_v46 = vld [vmem:[%s2857_s0 + $0x8] sm:$0xff]  ;;  %v75_v47 = vld [vmem:[%s2857_s0 + $0x18] sm:$0xff]  ;;  %v2272_v51 = vld [vmem:[#allocation2 + $0x184] ss:$16 sps:$4 sm:$0xff]  }
  0x47   :  { %v2271_v49 = vld [vmem:[#allocation2 + $0x168] ss:$16 sps:$4 sm:$0xff]   ;;  %v105_v50 = vpack.c.bf16 %v75_v47, %v73_v46  ;;  %v2274_v52 = vld [vmem:[#allocation2 + $0x18c] ss:$16 sps:$4 sm:$0xff]   ;;  %v2276_v53 = vld [vmem:[#allocation2 + $0x180] ss:$16 sps:$4 sm:$0xff]  }
  0x48   :  { %535 = vmatpush1.bf16.msra.mxu0 %v2228_v18  ;;  %648 = vmatpush1.bf16.msra.mxu1 %v2229_v19  ;;  %v2277_v54 = vld [vmem:[#allocation2 + $0x188] ss:$16 sps:$4 sm:$0xff]   ;;  %v2278_v55 = vld [vmem:[#allocation2 + $0x1a4] ss:$16 sps:$4 sm:$0xff]   ;;  %v2280_v56 = vld [vmem:[#allocation2 + $0x1ac] ss:$16 sps:$4 sm:$0xff]  }
  0x49   :  { %536 = vmatprep.subr.bf16.mxu0 %v2230_v20  ;;  %649 = vmatprep.subr.bf16.mxu1 %v2232_v21  ;;  %v2282_v57 = vld [vmem:[#allocation2 + $0x1a0] ss:$16 sps:$4 sm:$0xff]   ;;  %v2283_v58 = vld [vmem:[#allocation2 + $0x1a8] ss:$16 sps:$4 sm:$0xff]   ;;  %v2284_v59 = vld [vmem:[#allocation2 + $0x1c4] ss:$16 sps:$4 sm:$0xff]  }
  0x4a   :  { %558 = vmatprep.mubr.bf16.mxu0 %v105_v50  ;;  %671 = vmatprep.mubr.bf16.mxu1 %v105_v50  ;;  %v2286_v60 = vld [vmem:[#allocation2 + $0x1cc] ss:$16 sps:$4 sm:$0xff]   ;;  %v2288_v61 = vld [vmem:[#allocation2 + $0x1c0] ss:$16 sps:$4 sm:$0xff]   ;;  %v2289_v62 = vld [vmem:[#allocation2 + $0x1c8] ss:$16 sps:$4 sm:$0xff]  }
  0x4b   :  { %v2290_v63 = vld [vmem:[#allocation2 + $0x1e4] ss:$16 sps:$4 sm:$0xff]   ;;  %v2292_v0 = vld [vmem:[#allocation2 + $0x1ec] ss:$16 sps:$4 sm:$0xff]   ;;  %v2294_v1 = vld [vmem:[#allocation2 + $0x1e0] ss:$16 sps:$4 sm:$0xff]  }
  0x4c   :  { %537 = vmatpush1.bf16.msra.mxu0 %v2234_v22  ;;  %650 = vmatpush1.bf16.msra.mxu1 %v2235_v23  ;;  %v2295_v2 = vld [vmem:[#allocation2 + $0x1e8] ss:$16 sps:$4 sm:$0xff]   ;;  %v72_v3 = vld [vmem:[%s2857_s0] sm:$0xff]  ;;  %v74_v4 = vld [vmem:[%s2857_s0 + $0x10] sm:$0xff] }
  0x4d   :  { %538 = vmatprep.subr.bf16.mxu0 %v2236_v24  ;;  %651 = vmatprep.subr.bf16.mxu1 %v2238_v25  ;;  %v77_v5 = vld [vmem:[%s2857_s0 + $0x28] sm:$0xff]  ;;  %v79_v6 = vld [vmem:[%s2857_s0 + $0x38] sm:$0xff]  ;;  %v2296_v7 = vld [vmem:[%s2860_s3 + $0x40] sm:$0xff]   ;;  %v104_v9 = vpack.c.bf16 %v74_v4, %v72_v3 }
  0x4e   :  { %v2298_v8 = vld [vmem:[%s2860_s3 + $0xc0] sm:$0xff]   ;;  %v107_v11 = vpack.c.bf16 %v79_v6, %v77_v5  ;;  %v2300_v13 = vld [vmem:[%s2860_s3 + $0x48] sm:$0xff]   ;;  %v78_v15 = vld [vmem:[%s2857_s0 + $0x30] sm:$0xff] }
  0x4f   :  { %v2297_v10 = vld [vmem:[%s2860_s3] sm:$0xff]   ;;  %v2302_v16 = vld [vmem:[%s2860_s3 + $0xc8] sm:$0xff]   ;;  %v83_v18 = vld [vmem:[%s2857_s0 + $0x58] sm:$0xff] }
  0x50   :  { %539 = vmatpush1.bf16.msra.mxu0 %v2240_v26  ;;  %652 = vmatpush1.bf16.msra.mxu1 %v2241_v27  ;;  %v2299_v12 = vld [vmem:[%s2860_s3 + $0x80] sm:$0xff]   ;;  %v81_v17 = vld [vmem:[%s2857_s0 + $0x48] sm:$0xff]  ;;  %v2304_v21 = vld [vmem:[%s2860_s3 + $0x50] sm:$0xff]  }
  0x51   :  { %540 = vmatprep.subr.bf16.mxu0 %v2242_v28  ;;  %653 = vmatprep.subr.bf16.mxu1 %v2244_v29  ;;  %v76_v14 = vld [vmem:[%s2857_s0 + $0x20] sm:$0xff]  ;;  %v2301_v19 = vld [vmem:[%s2860_s3 + $0x8] sm:$0xff]   ;;  %v2306_v22 = vld [vmem:[%s2860_s3 + $0xd0] sm:$0xff]   ;;  %v109_v25 = vpack.c.bf16 %v83_v18, %v81_v17  ;;  %v186_v17 = vlaneseq }
  0x52   :  { %v2303_v20 = vld [vmem:[%s2860_s3 + $0x88] sm:$0xff]   ;;  %v106_v23 = vpack.c.bf16 %v78_v15, %v76_v14  ;;  %v2305_v24 = vld [vmem:[%s2860_s3 + $0x10] sm:$0xff]   ;;  %v2308_v27 = vld [vmem:[%s2860_s3 + $0x58] sm:$0xff]  }
  0x53   :  { %v2307_v26 = vld [vmem:[%s2860_s3 + $0x90] sm:$0xff]   ;;  %v80_v28 = vld [vmem:[%s2857_s0 + $0x40] sm:$0xff]  ;;  %v91_v46 = vld [vmem:[%s2857_s0 + $0x98] sm:$0xff]  ;;  %v187_v18 = vshrl.u32 %v186_v17, 7 }
  0x54   :  { %541 = vmatpush1.bf16.msra.mxu0 %v2246_v30  ;;  %654 = vmatpush1.bf16.msra.mxu1 %v2247_v31  ;;  %v82_v29 = vld [vmem:[%s2857_s0 + $0x50] sm:$0xff]  ;;  %v2310_v30 = vld [vmem:[%s2860_s3 + $0xd8] sm:$0xff]   ;;  %v85_v31 = vld [vmem:[%s2857_s0 + $0x68] sm:$0xff] }
  0x55   :  { %542 = vmatprep.subr.bf16.mxu0 %v2248_v32  ;;  %655 = vmatprep.subr.bf16.mxu1 %v2250_v33  ;;  %v87_v32 = vld [vmem:[%s2857_s0 + $0x78] sm:$0xff]  ;;  %v2317_v47 = vld [vmem:[%s2860_s3 + $0x28] sm:$0xff]   ;;  %v2322_v50 = vld [vmem:[%s2860_s3 + $0xf0] sm:$0xff]  }
  0x56   :  { %v2309_v33 = vld [vmem:[%s2860_s3 + $0x18] sm:$0xff]   ;;  %v96_v3 = vld [vmem:[%s2857_s0 + $0xc0] sm:$0xff]  ;;  %v98_v4 = vld [vmem:[%s2857_s0 + $0xd0] sm:$0xff] }
  0x57   :  { %v101_v5 = vld [vmem:[%s2857_s0 + $0xe8] sm:$0xff]  ;;  %v103_v6 = vld [vmem:[%s2857_s0 + $0xf8] sm:$0xff] }
  0x58   :  { %543 = vmatpush1.bf16.msra.mxu0 %v2252_v34  ;;  %656 = vmatpush1.bf16.msra.mxu1 %v2253_v35  ;;  %v2311_v34 = vld [vmem:[%s2860_s3 + $0x98] sm:$0xff]   ;;  %v2312_v35 = vld [vmem:[%s2860_s3 + $0x60] sm:$0xff]  }
  0x59   :  { %544 = vmatprep.subr.bf16.mxu0 %v2254_v36  ;;  %657 = vmatprep.subr.bf16.mxu1 %v2256_v37  ;;  %v2314_v36 = vld [vmem:[%s2860_s3 + $0xe0] sm:$0xff]   ;;  %v108_v37 = vpack.c.bf16 %v82_v29, %v80_v28  ;;  %v2325_v14 = vld [vmem:[%s2860_s3 + $0x38] sm:$0xff]  }
  0x5a   :  { %v2327_v15 = vld [vmem:[%s2860_s3 + $0xb8] sm:$0xff]  }
  0x5c   :  { %545 = vmatpush1.bf16.msra.mxu0 %v2258_v38  ;;  %658 = vmatpush1.bf16.msra.mxu1 %v2259_v39  ;;  %v2313_v38 = vld [vmem:[%s2860_s3 + $0x20] sm:$0xff]   ;;  %v111_v39 = vpack.c.bf16 %v87_v32, %v85_v31 }
  0x5d   :  { %546 = vmatprep.subr.bf16.mxu0 %v2260_v40  ;;  %659 = vmatprep.subr.bf16.mxu1 %v2262_v41  ;;  %v2315_v40 = vld [vmem:[%s2860_s3 + $0xa0] sm:$0xff]   ;;  %v2316_v41 = vld [vmem:[%s2860_s3 + $0x68] sm:$0xff]  }
  0x60   :  { %547 = vmatpush1.bf16.msra.mxu0 %v2264_v42  ;;  %660 = vmatpush1.bf16.msra.mxu1 %v2265_v43  ;;  %v2318_v42 = vld [vmem:[%s2860_s3 + $0xe8] sm:$0xff]   ;;  %v84_v43 = vld [vmem:[%s2857_s0 + $0x60] sm:$0xff] }
  0x61   :  { %548 = vmatprep.subr.bf16.mxu0 %v2266_v44  ;;  %661 = vmatprep.subr.bf16.mxu1 %v2268_v45  ;;  %v86_v44 = vld [vmem:[%s2857_s0 + $0x70] sm:$0xff]  ;;  %v89_v45 = vld [vmem:[%s2857_s0 + $0x88] sm:$0xff] }
  0x64   :  { %549 = vmatpush1.bf16.msra.mxu0 %v2270_v48  ;;  %662 = vmatpush1.bf16.msra.mxu1 %v2271_v49  ;;  %v2319_v48 = vld [vmem:[%s2860_s3 + $0xa8] sm:$0xff]   ;;  %v2320_v49 = vld [vmem:[%s2860_s3 + $0x70] sm:$0xff]  }
  0x65   :  { %550 = vmatprep.subr.bf16.mxu0 %v2272_v51  ;;  %663 = vmatprep.subr.bf16.mxu1 %v2274_v52  ;;  %v110_v51 = vpack.c.bf16 %v86_v44, %v84_v43  ;;  %v2321_v52 = vld [vmem:[%s2860_s3 + $0x30] sm:$0xff]  }
  0x68   :  { %551 = vmatpush1.bf16.msra.mxu0 %v2276_v53  ;;  %664 = vmatpush1.bf16.msra.mxu1 %v2277_v54  ;;  %v2323_v53 = vld [vmem:[%s2860_s3 + $0xb0] sm:$0xff]   ;;  %v113_v54 = vpack.c.bf16 %v91_v46, %v89_v45 }
  0x69   :  { %552 = vmatprep.subr.bf16.mxu0 %v2278_v55  ;;  %665 = vmatprep.subr.bf16.mxu1 %v2280_v56  ;;  %v88_v55 = vld [vmem:[%s2857_s0 + $0x80] sm:$0xff]  ;;  %v90_v56 = vld [vmem:[%s2857_s0 + $0x90] sm:$0xff] }
  0x6c   :  { %553 = vmatpush1.bf16.msra.mxu0 %v2282_v57  ;;  %666 = vmatpush1.bf16.msra.mxu1 %v2283_v58  ;;  %v93_v57 = vld [vmem:[%s2857_s0 + $0xa8] sm:$0xff]  ;;  %v95_v58 = vld [vmem:[%s2857_s0 + $0xb8] sm:$0xff] }
  0x6d   :  { %554 = vmatprep.subr.bf16.mxu0 %v2284_v59  ;;  %667 = vmatprep.subr.bf16.mxu1 %v2286_v60  ;;  %v112_v59 = vpack.c.bf16 %v90_v56, %v88_v55  ;;  %v115_v60 = vpack.c.bf16 %v95_v58, %v93_v57 }
  0x70   :  { %555 = vmatpush1.bf16.msra.mxu0 %v2288_v61  ;;  %668 = vmatpush1.bf16.msra.mxu1 %v2289_v62  ;;  %v92_v61 = vld [vmem:[%s2857_s0 + $0xa0] sm:$0xff]  ;;  %v94_v62 = vld [vmem:[%s2857_s0 + $0xb0] sm:$0xff] }
  0x71   :  { %556 = vmatprep.subr.bf16.mxu0 %v2290_v63  ;;  %669 = vmatprep.subr.bf16.mxu1 %v2292_v0  ;;  %v97_v63 = vld [vmem:[%s2857_s0 + $0xc8] sm:$0xff]  ;;  %v99_v0 = vld [vmem:[%s2857_s0 + $0xd8] sm:$0xff] }
  0x74   :  { %557 = vmatpush1.bf16.msra.mxu0 %v2294_v1  ;;  %670 = vmatpush1.bf16.msra.mxu1 %v2295_v2  ;;  %v114_v1 = vpack.c.bf16 %v94_v62, %v92_v61  ;;  %v117_v2 = vpack.c.bf16 %v99_v0, %v97_v63  ;;  %v2329_v62 = vld [vmem:[#allocation6 + $0x8] sm:$0xff]  }
  0x75   :  { %1969 = vmatprep.subr.bf16.mxu0 %v2296_v7  ;;  %2033 = vmatprep.subr.bf16.mxu1 %v2298_v8  ;;  %v116_v7 = vpack.c.bf16 %v98_v4, %v96_v3  ;;  %v119_v8 = vpack.c.bf16 %v103_v6, %v101_v5 }
  0x77   :  { %559 = vmatmul.mubr.bf16.vlgmr.msra.gmra.mrb[0].mxu0 %v104_v9  ;;  %672 = vmatmul.mubr.bf16.vlgmr.msra.gmra.mrb[0].mxu1 %v104_v9  ;;  %v100_v9 = vld [vmem:[%s2857_s0 + $0xe0] sm:$0xff] }
  0x78   :  { %568 = vmatprep.mubr.bf16.mxu0 %v107_v11  ;;  %681 = vmatprep.mubr.bf16.mxu1 %v107_v11 }
  0x79   :  { %1970 = vmatpush3.bf16.msra.mxu0 %v2297_v10  ;;  %2034 = vmatpush3.bf16.msra.mxu1 %v2299_v12  ;;  %v102_v10 = vld [vmem:[%s2857_s0 + $0xf0] sm:$0xff]  ;;  %v2324_v12 = vld [vmem:[%s2860_s3 + $0x78] sm:$0xff]  }
  0x7a   :  { %1971 = vmatprep.subr.bf16.mxu0 %v2300_v13  ;;  %2035 = vmatprep.subr.bf16.mxu1 %v2302_v16  ;;  %v118_v11 = vpack.c.bf16 %v102_v10, %v100_v9  ;;  %v2326_v13 = vld [vmem:[%s2860_s3 + $0xf8] sm:$0xff]   ;;  %v2706_v16 = vld [vmem:[#allocation6] sm:$0xff]  }
  0x7d   :  { %1972 = vmatpush3.bf16.msra.mxu0 %v2301_v19  ;;  %2036 = vmatpush3.bf16.msra.mxu1 %v2303_v20  ;;  %v188_v19 = vsub.s32 0, %v187_v18  ;;  %v196_v20 = vsub.s32 2, %v187_v18 }
  0x7e   :  { %1973 = vmatprep.subr.bf16.mxu0 %v2304_v21  ;;  %2037 = vmatprep.subr.bf16.mxu1 %v2306_v22  ;;  %v184_v21 = vld [vmem:[#allocation4] sm:$0xf]  ;;  %v192_v22 = vsub.s32 1, %v187_v18 }
  0x7f   :  { %569 = vmatmul.mubr.bf16.gmra.mrb[4].mxu0 %v106_v23  ;;  %682 = vmatmul.mubr.bf16.gmra.mrb[4].mxu1 %v106_v23  ;;  %v200_v23 = vsub.s32 3, %v187_v18 }
  0x80   :  { %578 = vmatprep.mubr.bf16.mxu0 %v109_v25  ;;  %691 = vmatprep.mubr.bf16.mxu1 %v109_v25  ;;  %v2711_v25 = vrot.slane %v184_v21, %v196_v20 }
  0x81   :  { %1974 = vmatpush3.bf16.msra.mxu0 %v2305_v24  ;;  %2038 = vmatpush3.bf16.msra.mxu1 %v2307_v26  ;;  %v2709_v24 = vrot.slane %v184_v21, %v188_v19  ;;  %v2713_v26 = vrot.slane %v184_v21, %v192_v22 }
  0x82   :  { %1975 = vmatprep.subr.bf16.mxu0 %v2308_v27  ;;  %2039 = vmatprep.subr.bf16.mxu1 %v2310_v30  ;;  %v2715_v27 = vrot.slane %v184_v21, %v200_v23 }
  0x85   :  { %1976 = vmatpush3.bf16.msra.mxu0 %v2309_v33  ;;  %2040 = vmatpush3.bf16.msra.mxu1 %v2311_v34 }
  0x86   :  { %1977 = vmatprep.subr.bf16.mxu0 %v2312_v35  ;;  %2041 = vmatprep.subr.bf16.mxu1 %v2314_v36 }
  0x87   :  { %579 = vmatmul.mubr.bf16.gmra.mrb[8].mxu0 %v108_v37  ;;  %692 = vmatmul.mubr.bf16.gmra.mrb[8].mxu1 %v108_v37 }
  0x88   :  { %588 = vmatprep.mubr.bf16.mxu0 %v111_v39  ;;  %701 = vmatprep.mubr.bf16.mxu1 %v111_v39 }
  0x89   :  { %1978 = vmatpush3.bf16.msra.mxu0 %v2313_v38  ;;  %2042 = vmatpush3.bf16.msra.mxu1 %v2315_v40 }
  0x8a   :  { %1979 = vmatprep.subr.bf16.mxu0 %v2316_v41  ;;  %2043 = vmatprep.subr.bf16.mxu1 %v2318_v42 }
  0x8d   :  { %1980 = vmatpush3.bf16.msra.mxu0 %v2317_v47  ;;  %2044 = vmatpush3.bf16.msra.mxu1 %v2319_v48 }
  0x8e   :  { %1981 = vmatprep.subr.bf16.mxu0 %v2320_v49  ;;  %2045 = vmatprep.subr.bf16.mxu1 %v2322_v50 }
  0x8f   :  { %589 = vmatmul.mubr.bf16.gmra.mrb[12].mxu0 %v110_v51  ;;  %702 = vmatmul.mubr.bf16.gmra.mrb[12].mxu1 %v110_v51 }
  0x90   :  { %598 = vmatprep.mubr.bf16.mxu0 %v113_v54  ;;  %711 = vmatprep.mubr.bf16.mxu1 %v113_v54 }
  0x91   :  { %1982 = vmatpush3.bf16.msra.mxu0 %v2321_v52  ;;  %2046 = vmatpush3.bf16.msra.mxu1 %v2323_v53 }
  0x92   :  { %1983 = vmatprep.subr.bf16.mxu0 %v2324_v12  ;;  %2047 = vmatprep.subr.bf16.mxu1 %v2326_v13 }
  0x95   :  { %1984 = vmatpush3.bf16.msra.mxu0 %v2325_v14  ;;  %2048 = vmatpush3.bf16.msra.mxu1 %v2327_v15  ;;  %v2330_v14 = vld [vmem:[#allocation6 + $0x10] sm:$0xff]  }
  0x96   :  { %2129 = vmatprep.subr.bf16.mxu0 %v2706_v16 }
  0x97   :  { %599 = vmatmul.mubr.bf16.gmra.mrb[16].mxu0 %v112_v59  ;;  %712 = vmatmul.mubr.bf16.gmra.mrb[16].mxu1 %v112_v59 }
  0x98   :  { %608 = vmatprep.mubr.bf16.mxu0 %v115_v60  ;;  %721 = vmatprep.mubr.bf16.mxu1 %v115_v60 }
  0x9f   :  { %609 = vmatmul.mubr.bf16.gmra.mrb[20].mxu0 %v114_v1  ;;  %722 = vmatmul.mubr.bf16.gmra.mrb[20].mxu1 %v114_v1 }
  0xa0   :  { %618 = vmatprep.mubr.bf16.mxu0 %v117_v2  ;;  %731 = vmatprep.mubr.bf16.mxu1 %v117_v2 }
  0xa7   :  { %619 = vmatmul.mubr.bf16.gmra.mrb[24].mxu0 %v116_v7  ;;  %732 = vmatmul.mubr.bf16.gmra.mrb[24].mxu1 %v116_v7 }
  0xa8   :  { %628 = vmatprep.mubr.bf16.mxu0 %v119_v8  ;;  %741 = vmatprep.mubr.bf16.mxu1 %v119_v8 }
  0xaf   :  { %629 = vmatmul.mubr.bf16.gmra.mrb[28].mxu0 %v118_v11  ;;  %742 = vmatmul.mubr.bf16.gmra.mrb[28].mxu1 %v118_v11 }
 0x14a   :  { %v560_v28 = vpop.f32.mrb[0].mxu0  ;;  %v673_v29 = vpop.f32.mrb[0].mxu1 }
 0x14b   :  { %v561_v30 = vadd.f32 %v560_v28, %v2709_v24  ;;  %v674_v31 = vadd.f32 %v673_v29, %v2711_v25  ;;  %v562_v32 = vpop.f32.mrb[1].mxu0  ;;  %v675_v33 = vpop.f32.mrb[1].mxu1 }
 0x14c   :  { %v563_v34 = vadd.f32 %v562_v32, %v2713_v26  ;;  %v676_v35 = vadd.f32 %v675_v33, %v2715_v27  ;;  %v564_v36 = vpop.f32.mrb[2].mxu0  ;;  %v677_v37 = vpop.f32.mrb[2].mxu1 }
 0x14d   :  { %v754_v38 = vmax.f32 %v674_v31, 0.0  ;;  %v565_v39 = vadd.f32 %v564_v36, %v2709_v24  ;;  %v678_v40 = vadd.f32 %v677_v37, %v2711_v25  ;;  %v566_v41 = vpop.f32.mrb[3].mxu0  ;;  %v679_v42 = vpop.f32.mrb[3].mxu1  ;;  %v752_v46 = vmax.f32 %v561_v30, 0.0 }
 0x14e   :  { %v755_v43 = vmax.f32 %v676_v35, 0.0  ;;  %v567_v44 = vadd.f32 %v566_v41, %v2713_v26  ;;  %v680_v45 = vadd.f32 %v679_v42, %v2715_v27  ;;  %v753_v49 = vmax.f32 %v563_v34, 0.0 }
 0x14f   :  { %v756_v47 = vmax.f32 %v565_v39, 0.0  ;;  %v758_v48 = vmax.f32 %v678_v40, 0.0 }
 0x150   :  { %v757_v50 = vmax.f32 %v567_v44, 0.0  ;;  %v759_v51 = vmax.f32 %v680_v45, 0.0 }
 0x151   :  { %v816_v52 = vpack.c.bf16 %v756_v47, %v752_v46  ;;  %v818_v53 = vpack.c.bf16 %v758_v48, %v754_v38 }
 0x152   :  { %v817_v54 = vpack.c.bf16 %v757_v50, %v753_v49  ;;  %v819_v55 = vpack.c.bf16 %v759_v51, %v755_v43  ;;  %v570_v56 = vpop.f32.mrb[4].mxu0  ;;  %v683_v57 = vpop.f32.mrb[4].mxu1 }
 0x153   :  { %v571_v58 = vadd.f32 %v570_v56, %v2709_v24  ;;  %v684_v59 = vadd.f32 %v683_v57, %v2711_v25  ;;  %v572_v60 = vpop.f32.mrb[5].mxu0  ;;  %v685_v61 = vpop.f32.mrb[5].mxu1 }
 0x154   :  { %v573_v63 = vadd.f32 %v572_v60, %v2713_v26  ;;  %v686_v0 = vadd.f32 %v685_v61, %v2715_v27  ;;  %v574_v1 = vpop.f32.mrb[6].mxu0  ;;  %v687_v2 = vpop.f32.mrb[6].mxu1  ;;  %1143 = vmatprep.mubr.bf16.mxu0 %v817_v54  ;;  %1240 = vmatprep.mubr.bf16.mxu1 %v819_v55 }
 0x155   :  { %v762_v3 = vmax.f32 %v684_v59, 0.0  ;;  %v575_v4 = vadd.f32 %v574_v1, %v2709_v24  ;;  %v688_v5 = vadd.f32 %v687_v2, %v2711_v25  ;;  %v576_v6 = vpop.f32.mrb[7].mxu0  ;;  %v689_v7 = vpop.f32.mrb[7].mxu1  ;;  %1144 = vmatmul.mubr.bf16.vlgmr.msra.gmra.mrb[32].mxu0 %v816_v52  ;;  %1241 = vmatmul.mubr.bf16.vlgmr.msra.gmra.mrb[32].mxu1 %v818_v53  ;;  %v760_v11 = vmax.f32 %v571_v58, 0.0 }
 0x156   :  { %v763_v8 = vmax.f32 %v686_v0, 0.0  ;;  %v577_v9 = vadd.f32 %v576_v6, %v2713_v26  ;;  %v690_v10 = vadd.f32 %v689_v7, %v2715_v27  ;;  %2130 = vmatpush3.bf16.msra.mxu0 %v2706_v16  ;;  %v761_v15 = vmax.f32 %v573_v63, 0.0 }
 0x157   :  { %v764_v12 = vmax.f32 %v575_v4, 0.0  ;;  %v766_v13 = vmax.f32 %v688_v5, 0.0  ;;  %2131 = vmatprep.subr.bf16.mxu0 %v2329_v62 }
 0x158   :  { %v765_v17 = vmax.f32 %v577_v9, 0.0  ;;  %v767_v18 = vmax.f32 %v690_v10, 0.0 }
 0x159   :  { %v820_v19 = vpack.c.bf16 %v764_v12, %v760_v11  ;;  %v822_v20 = vpack.c.bf16 %v766_v13, %v762_v3 }
 0x15a   :  { %v821_v21 = vpack.c.bf16 %v765_v17, %v761_v15  ;;  %v823_v22 = vpack.c.bf16 %v767_v18, %v763_v8  ;;  %v580_v23 = vpop.f32.mrb[8].mxu0  ;;  %v693_v28 = vpop.f32.mrb[8].mxu1  ;;  %2132 = vmatpush3.bf16.msra.mxu0 %v2329_v62 }
 0x15b   :  { %v581_v29 = vadd.f32 %v580_v23, %v2709_v24  ;;  %v694_v30 = vadd.f32 %v693_v28, %v2711_v25  ;;  %v582_v16 = vpop.f32.mrb[9].mxu0  ;;  %v695_v31 = vpop.f32.mrb[9].mxu1  ;;  %2133 = vmatprep.subr.bf16.mxu0 %v2330_v14 }
 0x15c   :  { %v583_v32 = vadd.f32 %v582_v16, %v2713_v26  ;;  %v696_v33 = vadd.f32 %v695_v31, %v2715_v27  ;;  %v584_v34 = vpop.f32.mrb[10].mxu0  ;;  %v697_v35 = vpop.f32.mrb[10].mxu1  ;;  %1151 = vmatprep.mubr.bf16.mxu0 %v821_v21  ;;  %1248 = vmatprep.mubr.bf16.mxu1 %v823_v22 }
 0x15d   :  { %v770_v36 = vmax.f32 %v694_v30, 0.0  ;;  %v585_v37 = vadd.f32 %v584_v34, %v2709_v24  ;;  %v698_v38 = vadd.f32 %v697_v35, %v2711_v25  ;;  %v586_v39 = vpop.f32.mrb[11].mxu0  ;;  %v699_v40 = vpop.f32.mrb[11].mxu1  ;;  %1152 = vmatmul.mubr.bf16.gmra.mrb[36].mxu0 %v820_v19  ;;  %1249 = vmatmul.mubr.bf16.gmra.mrb[36].mxu1 %v822_v20  ;;  %v768_v44 = vmax.f32 %v581_v29, 0.0 }
 0x15e   :  { %v771_v41 = vmax.f32 %v696_v33, 0.0  ;;  %v587_v42 = vadd.f32 %v586_v39, %v2713_v26  ;;  %v700_v43 = vadd.f32 %v699_v40, %v2715_v27  ;;  %2134 = vmatpush3.bf16.msra.mxu0 %v2330_v14  ;;  %v769_v47 = vmax.f32 %v583_v32, 0.0 }
 0x15f   :  { %v772_v45 = vmax.f32 %v585_v37, 0.0  ;;  %v774_v46 = vmax.f32 %v698_v38, 0.0 }
 0x160   :  { %v773_v48 = vmax.f32 %v587_v42, 0.0  ;;  %v775_v49 = vmax.f32 %v700_v43, 0.0 }
 0x161   :  { %v824_v50 = vpack.c.bf16 %v772_v45, %v768_v44  ;;  %v826_v51 = vpack.c.bf16 %v774_v46, %v770_v36 }
 0x162   :  { %v825_v52 = vpack.c.bf16 %v773_v48, %v769_v47  ;;  %v827_v53 = vpack.c.bf16 %v775_v49, %v771_v41  ;;  %v590_v54 = vpop.f32.mrb[12].mxu0  ;;  %v703_v55 = vpop.f32.mrb[12].mxu1 }
 0x163   :  { %v591_v56 = vadd.f32 %v590_v54, %v2709_v24  ;;  %v704_v57 = vadd.f32 %v703_v55, %v2711_v25  ;;  %v592_v58 = vpop.f32.mrb[13].mxu0  ;;  %v705_v59 = vpop.f32.mrb[13].mxu1 }
 0x164   :  { %v593_v60 = vadd.f32 %v592_v58, %v2713_v26  ;;  %v706_v61 = vadd.f32 %v705_v59, %v2715_v27  ;;  %v594_v62 = vpop.f32.mrb[14].mxu0  ;;  %v707_v63 = vpop.f32.mrb[14].mxu1  ;;  %1159 = vmatprep.mubr.bf16.mxu0 %v825_v52  ;;  %1256 = vmatprep.mubr.bf16.mxu1 %v827_v53 }
 0x165   :  { %v778_v0 = vmax.f32 %v704_v57, 0.0  ;;  %v595_v1 = vadd.f32 %v594_v62, %v2709_v24  ;;  %v708_v2 = vadd.f32 %v707_v63, %v2711_v25  ;;  %v596_v3 = vpop.f32.mrb[15].mxu0  ;;  %v709_v4 = vpop.f32.mrb[15].mxu1  ;;  %1160 = vmatmul.mubr.bf16.gmra.mrb[40].mxu0 %v824_v50  ;;  %1257 = vmatmul.mubr.bf16.gmra.mrb[40].mxu1 %v826_v51  ;;  %v776_v8 = vmax.f32 %v591_v56, 0.0 }
 0x166   :  { %v779_v5 = vmax.f32 %v706_v61, 0.0  ;;  %v597_v6 = vadd.f32 %v596_v3, %v2713_v26  ;;  %v710_v7 = vadd.f32 %v709_v4, %v2715_v27  ;;  %v777_v11 = vmax.f32 %v593_v60, 0.0 }
 0x167   :  { %v780_v9 = vmax.f32 %v595_v1, 0.0  ;;  %v782_v10 = vmax.f32 %v708_v2, 0.0 }
 0x168   :  { %v781_v12 = vmax.f32 %v597_v6, 0.0  ;;  %v783_v13 = vmax.f32 %v710_v7, 0.0 }
 0x169   :  { %v828_v14 = vpack.c.bf16 %v780_v9, %v776_v8  ;;  %v830_v15 = vpack.c.bf16 %v782_v10, %v778_v0 }
 0x16a   :  { %v829_v17 = vpack.c.bf16 %v781_v12, %v777_v11  ;;  %v831_v18 = vpack.c.bf16 %v783_v13, %v779_v5  ;;  %v600_v19 = vpop.f32.mrb[16].mxu0  ;;  %v713_v20 = vpop.f32.mrb[16].mxu1 }
 0x16b   :  { %v601_v21 = vadd.f32 %v600_v19, %v2709_v24  ;;  %v714_v22 = vadd.f32 %v713_v20, %v2711_v25  ;;  %v602_v23 = vpop.f32.mrb[17].mxu0  ;;  %v715_v28 = vpop.f32.mrb[17].mxu1 }
 0x16c   :  { %v603_v29 = vadd.f32 %v602_v23, %v2713_v26  ;;  %v716_v30 = vadd.f32 %v715_v28, %v2715_v27  ;;  %v604_v16 = vpop.f32.mrb[18].mxu0  ;;  %v717_v31 = vpop.f32.mrb[18].mxu1  ;;  %1167 = vmatprep.mubr.bf16.mxu0 %v829_v17  ;;  %1264 = vmatprep.mubr.bf16.mxu1 %v831_v18 }
 0x16d   :  { %v786_v32 = vmax.f32 %v714_v22, 0.0  ;;  %v605_v33 = vadd.f32 %v604_v16, %v2709_v24  ;;  %v718_v34 = vadd.f32 %v717_v31, %v2711_v25  ;;  %v606_v35 = vpop.f32.mrb[19].mxu0  ;;  %v719_v36 = vpop.f32.mrb[19].mxu1  ;;  %1168 = vmatmul.mubr.bf16.gmra.mrb[44].mxu0 %v828_v14  ;;  %1265 = vmatmul.mubr.bf16.gmra.mrb[44].mxu1 %v830_v15  ;;  %v784_v40 = vmax.f32 %v601_v21, 0.0 }
 0x16e   :  { %v787_v37 = vmax.f32 %v716_v30, 0.0  ;;  %v607_v38 = vadd.f32 %v606_v35, %v2713_v26  ;;  %v720_v39 = vadd.f32 %v719_v36, %v2715_v27  ;;  %v785_v43 = vmax.f32 %v603_v29, 0.0 }
 0x16f   :  { %v788_v41 = vmax.f32 %v605_v33, 0.0  ;;  %v790_v42 = vmax.f32 %v718_v34, 0.0 }
 0x170   :  { %v789_v44 = vmax.f32 %v607_v38, 0.0  ;;  %v791_v45 = vmax.f32 %v720_v39, 0.0 }
 0x171   :  { %v832_v46 = vpack.c.bf16 %v788_v41, %v784_v40  ;;  %v834_v47 = vpack.c.bf16 %v790_v42, %v786_v32 }
 0x172   :  { %v833_v48 = vpack.c.bf16 %v789_v44, %v785_v43  ;;  %v835_v49 = vpack.c.bf16 %v791_v45, %v787_v37  ;;  %v610_v50 = vpop.f32.mrb[20].mxu0  ;;  %v723_v51 = vpop.f32.mrb[20].mxu1 }
 0x173   :  { %v611_v52 = vadd.f32 %v610_v50, %v2709_v24  ;;  %v724_v53 = vadd.f32 %v723_v51, %v2711_v25  ;;  %v612_v54 = vpop.f32.mrb[21].mxu0  ;;  %v725_v55 = vpop.f32.mrb[21].mxu1 }
 0x174   :  { %v613_v56 = vadd.f32 %v612_v54, %v2713_v26  ;;  %v726_v57 = vadd.f32 %v725_v55, %v2715_v27  ;;  %v614_v58 = vpop.f32.mrb[22].mxu0  ;;  %v727_v59 = vpop.f32.mrb[22].mxu1  ;;  %1175 = vmatprep.mubr.bf16.mxu0 %v833_v48  ;;  %1272 = vmatprep.mubr.bf16.mxu1 %v835_v49 }
 0x175   :  { %v794_v60 = vmax.f32 %v724_v53, 0.0  ;;  %v615_v61 = vadd.f32 %v614_v58, %v2709_v24  ;;  %v728_v62 = vadd.f32 %v727_v59, %v2711_v25  ;;  %v616_v63 = vpop.f32.mrb[23].mxu0  ;;  %v729_v0 = vpop.f32.mrb[23].mxu1  ;;  %1176 = vmatmul.mubr.bf16.gmra.mrb[48].mxu0 %v832_v46  ;;  %1273 = vmatmul.mubr.bf16.gmra.mrb[48].mxu1 %v834_v47  ;;  %v792_v4 = vmax.f32 %v611_v52, 0.0 }
 0x176   :  { %v795_v1 = vmax.f32 %v726_v57, 0.0  ;;  %v617_v2 = vadd.f32 %v616_v63, %v2713_v26  ;;  %v730_v3 = vadd.f32 %v729_v0, %v2715_v27  ;;  %v793_v7 = vmax.f32 %v613_v56, 0.0 }
 0x177   :  { %v796_v5 = vmax.f32 %v615_v61, 0.0  ;;  %v798_v6 = vmax.f32 %v728_v62, 0.0 }
 0x178   :  { %v797_v8 = vmax.f32 %v617_v2, 0.0  ;;  %v799_v9 = vmax.f32 %v730_v3, 0.0 }
 0x179   :  { %v836_v10 = vpack.c.bf16 %v796_v5, %v792_v4  ;;  %v838_v11 = vpack.c.bf16 %v798_v6, %v794_v60 }
 0x17a   :  { %v837_v12 = vpack.c.bf16 %v797_v8, %v793_v7  ;;  %v839_v13 = vpack.c.bf16 %v799_v9, %v795_v1  ;;  %v620_v14 = vpop.f32.mrb[24].mxu0  ;;  %v733_v15 = vpop.f32.mrb[24].mxu1  ;;  %v2334_v9 = vld [vmem:[#allocation6 + $0x30] sm:$0xff]  }
 0x17b   :  { %v621_v17 = vadd.f32 %v620_v14, %v2709_v24  ;;  %v734_v18 = vadd.f32 %v733_v15, %v2711_v25  ;;  %v622_v19 = vpop.f32.mrb[25].mxu0  ;;  %v735_v20 = vpop.f32.mrb[25].mxu1  ;;  %v2339_v14 = vld [vmem:[%s2864_s7 + $0x18] sm:$0xff]   ;;  %v2340_v15 = vld [vmem:[%s2864_s7 + $0x20] sm:$0xff]  }
 0x17c   :  { %v623_v21 = vadd.f32 %v622_v19, %v2713_v26  ;;  %v736_v22 = vadd.f32 %v735_v20, %v2715_v27  ;;  %v624_v23 = vpop.f32.mrb[26].mxu0  ;;  %v737_v28 = vpop.f32.mrb[26].mxu1  ;;  %1183 = vmatprep.mubr.bf16.mxu0 %v837_v12  ;;  %1280 = vmatprep.mubr.bf16.mxu1 %v839_v13  ;;  %v2337_v12 = vld [vmem:[%s2864_s7 + $0x8] sm:$0xff]   ;;  %v2338_v13 = vld [vmem:[%s2864_s7 + $0x10] sm:$0xff]   ;;  %v2803_v20 = vld [vmem:[%s2861_s4] ss:$0 sm:$0xff] }
 0x17d   :  { %v802_v29 = vmax.f32 %v734_v18, 0.0  ;;  %v625_v30 = vadd.f32 %v624_v23, %v2709_v24  ;;  %v738_v16 = vadd.f32 %v737_v28, %v2711_v25  ;;  %v626_v31 = vpop.f32.mrb[27].mxu0  ;;  %v739_v32 = vpop.f32.mrb[27].mxu1  ;;  %1184 = vmatmul.mubr.bf16.gmra.mrb[52].mxu0 %v836_v10  ;;  %1281 = vmatmul.mubr.bf16.gmra.mrb[52].mxu1 %v838_v11  ;;  %v800_v36 = vmax.f32 %v621_v17, 0.0  ;;  %v2335_v10 = vld [vmem:[#allocation6 + $0x38] sm:$0xff]   ;;  %v2341_v17 = vld [vmem:[%s2864_s7 + $0x28] sm:$0xff]  }
 0x17e   :  { %v803_v33 = vmax.f32 %v736_v22, 0.0  ;;  %v627_v34 = vadd.f32 %v626_v31, %v2713_v26  ;;  %v740_v35 = vadd.f32 %v739_v32, %v2715_v27  ;;  %v801_v39 = vmax.f32 %v623_v21, 0.0  ;;  %v2336_v11 = vld [vmem:[%s2864_s7] sm:$0xff]  }
 0x17f   :  { %v804_v37 = vmax.f32 %v625_v30, 0.0  ;;  %v806_v38 = vmax.f32 %v738_v16, 0.0  ;;  %2161 = vmatprep.subr.bf16.mxu1 %v2336_v11 }
 0x180   :  { %v805_v40 = vmax.f32 %v627_v34, 0.0  ;;  %v807_v41 = vmax.f32 %v740_v35, 0.0  ;;  %2162 = vmatpush3.bf16.msra.mxu1 %v2336_v11 }
 0x181   :  { %v840_v42 = vpack.c.bf16 %v804_v37, %v800_v36  ;;  %v842_v43 = vpack.c.bf16 %v806_v38, %v802_v29  ;;  %2163 = vmatprep.subr.bf16.mxu1 %v2337_v12 }
 0x182   :  { %v841_v44 = vpack.c.bf16 %v805_v40, %v801_v39  ;;  %v843_v45 = vpack.c.bf16 %v807_v41, %v803_v33  ;;  %v630_v46 = vpop.f32.mrb[28].mxu0  ;;  %v743_v47 = vpop.f32.mrb[28].mxu1 }
 0x183   :  { %v631_v48 = vadd.f32 %v630_v46, %v2709_v24  ;;  %v744_v49 = vadd.f32 %v743_v47, %v2711_v25  ;;  %v632_v50 = vpop.f32.mrb[29].mxu0  ;;  %v745_v51 = vpop.f32.mrb[29].mxu1 }
 0x184   :  { %v633_v52 = vadd.f32 %v632_v50, %v2713_v26  ;;  %v746_v53 = vadd.f32 %v745_v51, %v2715_v27  ;;  %v634_v54 = vpop.f32.mrb[30].mxu0  ;;  %v747_v55 = vpop.f32.mrb[30].mxu1  ;;  %1191 = vmatprep.mubr.bf16.mxu0 %v841_v44  ;;  %1288 = vmatprep.mubr.bf16.mxu1 %v843_v45 }
 0x185   :  { %v810_v56 = vmax.f32 %v744_v49, 0.0  ;;  %v635_v57 = vadd.f32 %v634_v54, %v2709_v24  ;;  %v748_v58 = vadd.f32 %v747_v55, %v2711_v25  ;;  %v636_v59 = vpop.f32.mrb[31].mxu0  ;;  %v749_v60 = vpop.f32.mrb[31].mxu1  ;;  %1192 = vmatmul.mubr.bf16.gmra.mrb[56].mxu0 %v840_v42  ;;  %1289 = vmatmul.mubr.bf16.gmra.mrb[56].mxu1 %v842_v43  ;;  %v808_v0 = vmax.f32 %v631_v48, 0.0  ;;  %v2331_v25 = vld [vmem:[#allocation6 + $0x18] sm:$0xff]  }
 0x186   :  { %v811_v61 = vmax.f32 %v746_v53, 0.0  ;;  %v637_v62 = vadd.f32 %v636_v59, %v2713_v26  ;;  %v750_v63 = vadd.f32 %v749_v60, %v2715_v27  ;;  %v809_v3 = vmax.f32 %v633_v52, 0.0  ;;  %2135 = vmatprep.subr.bf16.mxu0 %v2331_v25  ;;  %v2332_v26 = vld [vmem:[#allocation6 + $0x20] sm:$0xff]   ;;  %v2333_v27 = vld [vmem:[#allocation6 + $0x28] sm:$0xff]   ;;  %2164 = vmatpush3.bf16.msra.mxu1 %v2337_v12 }
 0x187   :  { %v812_v1 = vmax.f32 %v635_v57, 0.0  ;;  %v814_v2 = vmax.f32 %v748_v58, 0.0  ;;  %2136 = vmatpush3.bf16.msra.mxu0 %v2331_v25  ;;  %2165 = vmatprep.subr.bf16.mxu1 %v2338_v13 }
 0x188   :  { %v813_v4 = vmax.f32 %v637_v62, 0.0  ;;  %v815_v5 = vmax.f32 %v750_v63, 0.0  ;;  %2137 = vmatprep.subr.bf16.mxu0 %v2332_v26 }
 0x189   :  { %v844_v6 = vpack.c.bf16 %v812_v1, %v808_v0  ;;  %v846_v7 = vpack.c.bf16 %v814_v2, %v810_v56 }
 0x18a   :  { %v845_v24 = vpack.c.bf16 %v813_v4, %v809_v3  ;;  %v847_v8 = vpack.c.bf16 %v815_v5, %v811_v61  ;;  %2166 = vmatpush3.bf16.msra.mxu1 %v2338_v13 }
 0x18b   :  { %2138 = vmatpush3.bf16.msra.mxu0 %v2332_v26  ;;  %2167 = vmatprep.subr.bf16.mxu1 %v2339_v14 }
 0x18c   :  { %1199 = vmatprep.mubr.bf16.mxu0 %v845_v24  ;;  %1296 = vmatprep.mubr.bf16.mxu1 %v847_v8 }
 0x18d   :  { %1200 = vmatmul.mubr.bf16.gmra.mrb[60].mxu0 %v844_v6  ;;  %1297 = vmatmul.mubr.bf16.gmra.mrb[60].mxu1 %v846_v7 }
 0x18e   :  { %2139 = vmatprep.subr.bf16.mxu0 %v2333_v27  ;;  %2168 = vmatpush3.bf16.msra.mxu1 %v2339_v14 }
 0x18f   :  { %2140 = vmatpush3.bf16.msra.mxu0 %v2333_v27  ;;  %2169 = vmatprep.subr.bf16.mxu1 %v2340_v15 }
 0x190   :  { %2141 = vmatprep.subr.bf16.mxu0 %v2334_v9 }
 0x192   :  { %2170 = vmatpush3.bf16.msra.mxu1 %v2340_v15 }
 0x193   :  { %2142 = vmatpush3.bf16.msra.mxu0 %v2334_v9  ;;  %2171 = vmatprep.subr.bf16.mxu1 %v2341_v17 }
 0x194   :  { %2143 = vmatprep.subr.bf16.mxu0 %v2335_v10 }
 0x196   :  { %2172 = vmatpush3.bf16.msra.mxu1 %v2341_v17 }
 0x197   :  { %2144 = vmatpush3.bf16.msra.mxu0 %v2335_v10 }
 0x228   :  { %v1985_v18 = vpop.f32.mrb[32].mxu0  ;;  %v2049_v19 = vpop.f32.mrb[32].mxu1 }
 0x229   :  { %v1986_v21 = vpop.f32.mrb[33].mxu0  ;;  %v2050_v22 = vpop.f32.mrb[33].mxu1 }
 0x22a   :  { %v1987_v23 = vadd.f32 %v1986_v21, %v1985_v18  ;;  %v2051_v28 = vadd.f32 %v2050_v22, %v2049_v19  ;;  %v1988_v29 = vpop.f32.mrb[34].mxu0  ;;  %v2052_v30 = vpop.f32.mrb[34].mxu1 }
 0x22b   :  { %v1989_v16 = vpop.f32.mrb[35].mxu0  ;;  %v2053_v31 = vpop.f32.mrb[35].mxu1 }
 0x22c   :  { %v1146_v32 = vadd.f32 %v1987_v23, %v2803_v20  ;;  %v1990_v33 = vadd.f32 %v1989_v16, %v1988_v29  ;;  %v2054_v34 = vadd.f32 %v2053_v31, %v2052_v30 }
 0x22e   :  { %v1243_v35 = vadd.f32 %v2051_v28, %v1146_v32  ;;  %v1149_v36 = vadd.f32 %v1990_v33, %v2803_v20 }
 0x230   :  { %v1246_v37 = vadd.f32 %v2054_v34, %v1149_v36  ;;  %v1991_v38 = vpop.f32.mrb[36].mxu0  ;;  %v2055_v39 = vpop.f32.mrb[36].mxu1  ;;  %v1305_v42 = vmax.f32 %v1243_v35, 0.0 }
 0x231   :  { %v1992_v40 = vpop.f32.mrb[37].mxu0  ;;  %v2056_v41 = vpop.f32.mrb[37].mxu1 }
 0x232   :  { %v1306_v43 = vmax.f32 %v1246_v37, 0.0  ;;  %v1993_v44 = vadd.f32 %v1992_v40, %v1991_v38  ;;  %v2057_v45 = vadd.f32 %v2056_v41, %v2055_v39  ;;  %v1994_v46 = vpop.f32.mrb[38].mxu0  ;;  %v2058_v47 = vpop.f32.mrb[38].mxu1 }
 0x233   :  { %v1995_v48 = vpop.f32.mrb[39].mxu0  ;;  %v2059_v49 = vpop.f32.mrb[39].mxu1 }
 0x234   :  { %v1154_v50 = vadd.f32 %v1993_v44, %v2803_v20  ;;  %v1996_v51 = vadd.f32 %v1995_v48, %v1994_v46  ;;  %v2060_v52 = vadd.f32 %v2059_v49, %v2058_v47  ;;  %v1321_v53 = vpack.c.bf16 %v1306_v43, %v1305_v42 }
 0x236   :  { %v1251_v54 = vadd.f32 %v2057_v45, %v1154_v50  ;;  %v1157_v55 = vadd.f32 %v1996_v51, %v2803_v20  ;;  %2145 = vmatprep.mubr.bf16.mxu0 %v1321_v53 }
 0x238   :  { %v1254_v56 = vadd.f32 %v2060_v52, %v1157_v55  ;;  %v1997_v57 = vpop.f32.mrb[40].mxu0  ;;  %v2061_v58 = vpop.f32.mrb[40].mxu1  ;;  %v1307_v61 = vmax.f32 %v1251_v54, 0.0 }
 0x239   :  { %v1998_v59 = vpop.f32.mrb[41].mxu0  ;;  %v2062_v60 = vpop.f32.mrb[41].mxu1 }
 0x23a   :  { %v1308_v62 = vmax.f32 %v1254_v56, 0.0  ;;  %v1999_v63 = vadd.f32 %v1998_v59, %v1997_v57  ;;  %v2063_v0 = vadd.f32 %v2062_v60, %v2061_v58  ;;  %v2000_v1 = vpop.f32.mrb[42].mxu0  ;;  %v2064_v2 = vpop.f32.mrb[42].mxu1 }
 0x23b   :  { %v2001_v3 = vpop.f32.mrb[43].mxu0  ;;  %v2065_v4 = vpop.f32.mrb[43].mxu1 }
 0x23c   :  { %v1322_v5 = vpack.c.bf16 %v1308_v62, %v1307_v61  ;;  %v1162_v6 = vadd.f32 %v1999_v63, %v2803_v20  ;;  %v2002_v7 = vadd.f32 %v2001_v3, %v2000_v1  ;;  %v2066_v24 = vadd.f32 %v2065_v4, %v2064_v2 }
 0x23e   :  { %v1259_v8 = vadd.f32 %v2063_v0, %v1162_v6  ;;  %v1165_v25 = vadd.f32 %v2002_v7, %v2803_v20  ;;  %2146 = vmatmul.mubr.bf16.vlgmr.msra.gmra.mrb[64].mxu0 %v1322_v5 }
 0x240   :  { %v1262_v26 = vadd.f32 %v2066_v24, %v1165_v25  ;;  %v2003_v27 = vpop.f32.mrb[44].mxu0  ;;  %v2067_v9 = vpop.f32.mrb[44].mxu1  ;;  %v1309_v12 = vmax.f32 %v1259_v8, 0.0 }
 0x241   :  { %v2004_v10 = vpop.f32.mrb[45].mxu0  ;;  %v2068_v11 = vpop.f32.mrb[45].mxu1 }
 0x242   :  { %v1310_v13 = vmax.f32 %v1262_v26, 0.0  ;;  %v2005_v14 = vadd.f32 %v2004_v10, %v2003_v27  ;;  %v2069_v15 = vadd.f32 %v2068_v11, %v2067_v9  ;;  %v2006_v17 = vpop.f32.mrb[46].mxu0  ;;  %v2070_v18 = vpop.f32.mrb[46].mxu1 }
 0x243   :  { %v2007_v19 = vpop.f32.mrb[47].mxu0  ;;  %v2071_v21 = vpop.f32.mrb[47].mxu1 }
 0x244   :  { %v1170_v22 = vadd.f32 %v2005_v14, %v2803_v20  ;;  %v2008_v23 = vadd.f32 %v2007_v19, %v2006_v17  ;;  %v2072_v28 = vadd.f32 %v2071_v21, %v2070_v18  ;;  %v1323_v29 = vpack.c.bf16 %v1310_v13, %v1309_v12 }
 0x246   :  { %v1267_v30 = vadd.f32 %v2069_v15, %v1170_v22  ;;  %v1173_v16 = vadd.f32 %v2008_v23, %v2803_v20  ;;  %2149 = vmatprep.mubr.bf16.mxu0 %v1323_v29 }
 0x248   :  { %v1270_v31 = vadd.f32 %v2072_v28, %v1173_v16  ;;  %v2009_v32 = vpop.f32.mrb[48].mxu0  ;;  %v2073_v33 = vpop.f32.mrb[48].mxu1  ;;  %v1311_v36 = vmax.f32 %v1267_v30, 0.0 }
 0x249   :  { %v2010_v34 = vpop.f32.mrb[49].mxu0  ;;  %v2074_v35 = vpop.f32.mrb[49].mxu1 }
 0x24a   :  { %v1312_v37 = vmax.f32 %v1270_v31, 0.0  ;;  %v2011_v38 = vadd.f32 %v2010_v34, %v2009_v32  ;;  %v2075_v39 = vadd.f32 %v2074_v35, %v2073_v33  ;;  %v2012_v40 = vpop.f32.mrb[50].mxu0  ;;  %v2076_v41 = vpop.f32.mrb[50].mxu1 }
 0x24b   :  { %v2013_v42 = vpop.f32.mrb[51].mxu0  ;;  %v2077_v43 = vpop.f32.mrb[51].mxu1 }
 0x24c   :  { %v1178_v44 = vadd.f32 %v2011_v38, %v2803_v20  ;;  %v2014_v45 = vadd.f32 %v2013_v42, %v2012_v40  ;;  %v2078_v46 = vadd.f32 %v2077_v43, %v2076_v41  ;;  %v1324_v47 = vpack.c.bf16 %v1312_v37, %v1311_v36 }
 0x24e   :  { %v1275_v48 = vadd.f32 %v2075_v39, %v1178_v44  ;;  %v1181_v49 = vadd.f32 %v2014_v45, %v2803_v20  ;;  %2150 = vmatmul.mubr.bf16.gmra.mrb[68].mxu0 %v1324_v47 }
 0x250   :  { %v1278_v50 = vadd.f32 %v2078_v46, %v1181_v49  ;;  %v2015_v51 = vpop.f32.mrb[52].mxu0  ;;  %v2079_v52 = vpop.f32.mrb[52].mxu1  ;;  %v1313_v55 = vmax.f32 %v1275_v48, 0.0  ;;  %v2342_v48 = vld [vmem:[%s2864_s7 + $0x30] sm:$0xff]   ;;  %v2343_v49 = vld [vmem:[%s2864_s7 + $0x38] sm:$0xff]  }
 0x251   :  { %v2016_v53 = vpop.f32.mrb[53].mxu0  ;;  %v2080_v54 = vpop.f32.mrb[53].mxu1  ;;  %2173 = vmatprep.subr.bf16.mxu1 %v2342_v48 }
 0x252   :  { %v1314_v56 = vmax.f32 %v1278_v50, 0.0  ;;  %v2017_v57 = vadd.f32 %v2016_v53, %v2015_v51  ;;  %v2081_v58 = vadd.f32 %v2080_v54, %v2079_v52  ;;  %v2018_v59 = vpop.f32.mrb[54].mxu0  ;;  %v2082_v60 = vpop.f32.mrb[54].mxu1  ;;  %2174 = vmatpush3.bf16.msra.mxu1 %v2342_v48 }
 0x253   :  { %v2019_v61 = vpop.f32.mrb[55].mxu0  ;;  %v2083_v62 = vpop.f32.mrb[55].mxu1  ;;  %2175 = vmatprep.subr.bf16.mxu1 %v2343_v49 }
 0x254   :  { %v1186_v63 = vadd.f32 %v2017_v57, %v2803_v20  ;;  %v2020_v0 = vadd.f32 %v2019_v61, %v2018_v59  ;;  %v2084_v1 = vadd.f32 %v2083_v62, %v2082_v60  ;;  %v1325_v2 = vpack.c.bf16 %v1314_v56, %v1313_v55 }
 0x256   :  { %v1283_v3 = vadd.f32 %v2081_v58, %v1186_v63  ;;  %v1189_v4 = vadd.f32 %v2020_v0, %v2803_v20  ;;  %2153 = vmatprep.mubr.bf16.mxu0 %v1325_v2  ;;  %2176 = vmatpush3.bf16.msra.mxu1 %v2343_v49 }
 0x258   :  { %v1286_v5 = vadd.f32 %v2084_v1, %v1189_v4  ;;  %v2021_v6 = vpop.f32.mrb[56].mxu0  ;;  %v2085_v7 = vpop.f32.mrb[56].mxu1  ;;  %v1315_v25 = vmax.f32 %v1283_v3, 0.0 }
 0x259   :  { %v2022_v24 = vpop.f32.mrb[57].mxu0  ;;  %v2086_v8 = vpop.f32.mrb[57].mxu1 }
 0x25a   :  { %v1316_v26 = vmax.f32 %v1286_v5, 0.0  ;;  %v2023_v27 = vadd.f32 %v2022_v24, %v2021_v6  ;;  %v2087_v9 = vadd.f32 %v2086_v8, %v2085_v7  ;;  %v2024_v10 = vpop.f32.mrb[58].mxu0  ;;  %v2088_v11 = vpop.f32.mrb[58].mxu1 }
 0x25b   :  { %v2025_v12 = vpop.f32.mrb[59].mxu0  ;;  %v2089_v13 = vpop.f32.mrb[59].mxu1 }
 0x25c   :  { %v1194_v14 = vadd.f32 %v2023_v27, %v2803_v20  ;;  %v2026_v15 = vadd.f32 %v2025_v12, %v2024_v10  ;;  %v2090_v17 = vadd.f32 %v2089_v13, %v2088_v11  ;;  %v1326_v18 = vpack.c.bf16 %v1316_v26, %v1315_v25 }
 0x25e   :  { %v1291_v19 = vadd.f32 %v2087_v9, %v1194_v14  ;;  %v1197_v21 = vadd.f32 %v2026_v15, %v2803_v20  ;;  %2154 = vmatmul.mubr.bf16.gmra.mrb[72].mxu0 %v1326_v18 }
 0x260   :  { %v1294_v22 = vadd.f32 %v2090_v17, %v1197_v21  ;;  %v2027_v23 = vpop.f32.mrb[60].mxu0  ;;  %v2091_v28 = vpop.f32.mrb[60].mxu1  ;;  %v1317_v16 = vmax.f32 %v1291_v19, 0.0 }
 0x261   :  { %v2028_v29 = vpop.f32.mrb[61].mxu0  ;;  %v2092_v30 = vpop.f32.mrb[61].mxu1 }
 0x262   :  { %v1318_v31 = vmax.f32 %v1294_v22, 0.0  ;;  %v2029_v32 = vadd.f32 %v2028_v29, %v2027_v23  ;;  %v2093_v33 = vadd.f32 %v2092_v30, %v2091_v28  ;;  %v2030_v34 = vpop.f32.mrb[62].mxu0  ;;  %v2094_v35 = vpop.f32.mrb[62].mxu1 }
 0x263   :  { %v2031_v36 = vpop.f32.mrb[63].mxu0  ;;  %v2095_v37 = vpop.f32.mrb[63].mxu1 }
 0x264   :  { %v1202_v38 = vadd.f32 %v2029_v32, %v2803_v20  ;;  %v2032_v39 = vadd.f32 %v2031_v36, %v2030_v34  ;;  %v2096_v40 = vadd.f32 %v2095_v37, %v2094_v35  ;;  %v1327_v41 = vpack.c.bf16 %v1318_v31, %v1317_v16 }
 0x266   :  { %v1299_v42 = vadd.f32 %v2093_v33, %v1202_v38  ;;  %v1205_v43 = vadd.f32 %v2032_v39, %v2803_v20  ;;  %2157 = vmatprep.mubr.bf16.mxu0 %v1327_v41  ;;  %v1872_v20 = vld [vmem:[%s2863_s6] ss:$0 sm:$0xff] }
 0x268   :  { %v1302_v44 = vadd.f32 %v2096_v40, %v1205_v43  ;;  %v1319_v45 = vmax.f32 %v1299_v42, 0.0 }
 0x26a   :  { %v1320_v46 = vmax.f32 %v1302_v44, 0.0  ;;  %v1881_v44 = vld [vmem:[%s2865_s8] ss:$0 sm:$0xff] }
 0x26c   :  { %v1328_v47 = vpack.c.bf16 %v1320_v46, %v1319_v45 }
 0x26e   :  { %2158 = vmatmul.mubr.bf16.gmra.mrb[76].mxu0 %v1328_v47 }
 0x311   :  { %v2147_v50 = vpop.f32.mrb[64].mxu0 }
 0x312   :  { %v1443_v51 = vadd.f32 %v2147_v50, %v1872_v20  ;;  %v1434_v52 = vpop.f32.mrb[65].mxu0 }
 0x313   :  { %v1435_v53 = vadd.f32 %v1872_v20, %v1434_v52  ;;  %v2148_v54 = vpop.f32.mrb[66].mxu0 }
 0x314   :  { %v1446_v55 = vadd.f32 %v2148_v54, %v1872_v20  ;;  %v1437_v56 = vpop.f32.mrb[67].mxu0  ;;  %v1499_v58 = vmax.f32 %v1443_v51, 0.0 }
 0x315   :  { %v1438_v57 = vadd.f32 %v1872_v20, %v1437_v56  ;;  %v1497_v60 = vmax.f32 %v1435_v53, 0.0 }
 0x316   :  { %v1500_v59 = vmax.f32 %v1446_v55, 0.0 }
 0x317   :  { %v1498_v61 = vmax.f32 %v1438_v57, 0.0 }
 0x318   :  { %v1514_v62 = vpack.c.bf16 %v1500_v59, %v1499_v58 }
 0x319   :  { %v1513_v63 = vpack.c.bf16 %v1498_v61, %v1497_v60 }
 0x31b   :  { %2177 = vmatprep.mubr.bf16.mxu1 %v1513_v63 }
 0x31c   :  { %2178 = vmatmul.mubr.bf16.vlgmr.msra.gmra.mrb[64].mxu1 %v1514_v62 }
 0x321   :  { %v2151_v0 = vpop.f32.mrb[68].mxu0 }
 0x322   :  { %v1459_v1 = vadd.f32 %v2151_v0, %v1872_v20  ;;  %v1450_v2 = vpop.f32.mrb[69].mxu0 }
 0x323   :  { %v1451_v3 = vadd.f32 %v1872_v20, %v1450_v2  ;;  %v2152_v4 = vpop.f32.mrb[70].mxu0 }
 0x324   :  { %v1462_v5 = vadd.f32 %v2152_v4, %v1872_v20  ;;  %v1453_v6 = vpop.f32.mrb[71].mxu0  ;;  %v1503_v24 = vmax.f32 %v1459_v1, 0.0 }
 0x325   :  { %v1454_v7 = vadd.f32 %v1872_v20, %v1453_v6  ;;  %v1501_v25 = vmax.f32 %v1451_v3, 0.0 }
 0x326   :  { %v1504_v8 = vmax.f32 %v1462_v5, 0.0 }
 0x327   :  { %v1502_v26 = vmax.f32 %v1454_v7, 0.0 }
 0x328   :  { %v1516_v27 = vpack.c.bf16 %v1504_v8, %v1503_v24 }
 0x329   :  { %v1515_v9 = vpack.c.bf16 %v1502_v26, %v1501_v25 }
 0x32b   :  { %2181 = vmatprep.mubr.bf16.mxu1 %v1515_v9 }
 0x32c   :  { %2182 = vmatmul.mubr.bf16.gmra.mrb[68].mxu1 %v1516_v27 }
 0x331   :  { %v2155_v10 = vpop.f32.mrb[72].mxu0 }
 0x332   :  { %v1475_v11 = vadd.f32 %v2155_v10, %v1872_v20  ;;  %v1466_v12 = vpop.f32.mrb[73].mxu0 }
 0x333   :  { %v1467_v13 = vadd.f32 %v1872_v20, %v1466_v12  ;;  %v2156_v14 = vpop.f32.mrb[74].mxu0 }
 0x334   :  { %v1478_v15 = vadd.f32 %v2156_v14, %v1872_v20  ;;  %v1469_v17 = vpop.f32.mrb[75].mxu0  ;;  %v1507_v19 = vmax.f32 %v1475_v11, 0.0 }
 0x335   :  { %v1470_v18 = vadd.f32 %v1872_v20, %v1469_v17  ;;  %v1505_v22 = vmax.f32 %v1467_v13, 0.0 }
 0x336   :  { %v1508_v21 = vmax.f32 %v1478_v15, 0.0 }
 0x337   :  { %v1506_v23 = vmax.f32 %v1470_v18, 0.0 }
 0x338   :  { %v1518_v28 = vpack.c.bf16 %v1508_v21, %v1507_v19 }
 0x339   :  { %v1517_v29 = vpack.c.bf16 %v1506_v23, %v1505_v22 }
 0x33b   :  { %2185 = vmatprep.mubr.bf16.mxu1 %v1517_v29 }
 0x33c   :  { %2186 = vmatmul.mubr.bf16.gmra.mrb[72].mxu1 %v1518_v28 }
 0x341   :  { %v2159_v30 = vpop.f32.mrb[76].mxu0 }
 0x342   :  { %v1491_v16 = vadd.f32 %v2159_v30, %v1872_v20  ;;  %v1482_v31 = vpop.f32.mrb[77].mxu0 }
 0x343   :  { %v1483_v32 = vadd.f32 %v1872_v20, %v1482_v31  ;;  %v2160_v33 = vpop.f32.mrb[78].mxu0 }
 0x344   :  { %v1494_v34 = vadd.f32 %v2160_v33, %v1872_v20  ;;  %v1485_v35 = vpop.f32.mrb[79].mxu0  ;;  %v1511_v37 = vmax.f32 %v1491_v16, 0.0 }
 0x345   :  { %v1486_v36 = vadd.f32 %v1872_v20, %v1485_v35  ;;  %v1509_v39 = vmax.f32 %v1483_v32, 0.0 }
 0x346   :  { %v1512_v38 = vmax.f32 %v1494_v34, 0.0 }
 0x347   :  { %v1510_v40 = vmax.f32 %v1486_v36, 0.0 }
 0x348   :  { %v1520_v41 = vpack.c.bf16 %v1512_v38, %v1511_v37 }
 0x349   :  { %v1519_v42 = vpack.c.bf16 %v1510_v40, %v1509_v39 }
 0x34b   :  { %2189 = vmatprep.mubr.bf16.mxu1 %v1519_v42 }
 0x34c   :  { %2190 = vmatmul.mubr.bf16.gmra.mrb[76].mxu1 %v1520_v41 }
 0x3ef   :  { %v2179_v43 = vpop.f32.mrb[64].mxu1 }
 0x3f0   :  { %v1626_v45 = vpop.f32.mrb[65].mxu1  ;;  %v1635_v47 = vadd.f32 %v2179_v43, %v1881_v44 }
 0x3f1   :  { %v2180_v46 = vpop.f32.mrb[66].mxu1  ;;  %v1627_v50 = vadd.f32 %v1881_v44, %v1626_v45 }
 0x3f2   :  { %v1638_v48 = vadd.f32 %v2180_v46, %v1881_v44  ;;  %v1629_v49 = vpop.f32.mrb[67].mxu1 }
 0x3f3   :  { %v1630_v20 = vadd.f32 %v1881_v44, %v1629_v49 }
 0x3f4   :  { %v1930_v51 = vpack.c.bf16 %v1638_v48, %v1635_v47 }
 0x3f5   :  { %v1925_v52 = vpack.c.bf16 %v1630_v20, %v1627_v50 }
 0x3f6   :  { %1962 = vst [vmem:[%s2866_s9 + $0x8] sm:$0xff] %v1930_v51  }
 0x3f7   :  { %1926 = vst [vmem:[%s2866_s9] sm:$0xff] %v1925_v52  }
 0x3ff   :  { %v2183_v53 = vpop.f32.mrb[68].mxu1 }
 0x400   :  { %v1642_v54 = vpop.f32.mrb[69].mxu1  ;;  %v1651_v56 = vadd.f32 %v2183_v53, %v1881_v44 }
 0x401   :  { %v2184_v55 = vpop.f32.mrb[70].mxu1  ;;  %v1643_v59 = vadd.f32 %v1881_v44, %v1642_v54 }
 0x402   :  { %v1654_v57 = vadd.f32 %v2184_v55, %v1881_v44  ;;  %v1645_v58 = vpop.f32.mrb[71].mxu1 }
 0x403   :  { %v1646_v60 = vadd.f32 %v1881_v44, %v1645_v58 }
 0x404   :  { %v1940_v61 = vpack.c.bf16 %v1654_v57, %v1651_v56 }
 0x405   :  { %v1935_v62 = vpack.c.bf16 %v1646_v60, %v1643_v59 }
 0x406   :  { %1964 = vst [vmem:[%s2866_s9 + $0x18] sm:$0xff] %v1940_v61  }
 0x407   :  { %1963 = vst [vmem:[%s2866_s9 + $0x10] sm:$0xff] %v1935_v62  }
 0x40f   :  { %v2187_v63 = vpop.f32.mrb[72].mxu1 }
 0x410   :  { %v1658_v0 = vpop.f32.mrb[73].mxu1  ;;  %v1667_v2 = vadd.f32 %v2187_v63, %v1881_v44 }
 0x411   :  { %v2188_v1 = vpop.f32.mrb[74].mxu1  ;;  %v1659_v5 = vadd.f32 %v1881_v44, %v1658_v0 }
 0x412   :  { %v1670_v3 = vadd.f32 %v2188_v1, %v1881_v44  ;;  %v1661_v4 = vpop.f32.mrb[75].mxu1 }
 0x413   :  { %v1662_v6 = vadd.f32 %v1881_v44, %v1661_v4 }
 0x414   :  { %v1950_v7 = vpack.c.bf16 %v1670_v3, %v1667_v2 }
 0x415   :  { %v1945_v24 = vpack.c.bf16 %v1662_v6, %v1659_v5 }
 0x416   :  { %1966 = vst [vmem:[%s2866_s9 + $0x28] sm:$0xff] %v1950_v7  }
 0x417   :  { %1965 = vst [vmem:[%s2866_s9 + $0x20] sm:$0xff] %v1945_v24  }
 0x41f   :  { %v2191_v8 = vpop.f32.mrb[76].mxu1 }
 0x420   :  { %v1674_v25 = vpop.f32.mrb[77].mxu1  ;;  %v1683_v27 = vadd.f32 %v2191_v8, %v1881_v44 }
 0x421   :  { %v2192_v26 = vpop.f32.mrb[78].mxu1  ;;  %v1675_v11 = vadd.f32 %v1881_v44, %v1674_v25 }
 0x422   :  { %v1686_v9 = vadd.f32 %v2192_v26, %v1881_v44  ;;  %v1677_v10 = vpop.f32.mrb[79].mxu1 }
 0x423   :  { %v1678_v12 = vadd.f32 %v1881_v44, %v1677_v10 }
 0x424   :  { %v1960_v13 = vpack.c.bf16 %v1686_v9, %v1683_v27 }
 0x425   :  { %v1955_v14 = vpack.c.bf16 %v1678_v12, %v1675_v11 }
 0x426   :  { %1968 = vst [vmem:[%s2866_s9 + $0x38] sm:$0xff] %v1960_v13  }
 0x427   :  { %1967 = vst [vmem:[%s2866_s9 + $0x30] sm:$0xff] %v1955_v14  }
 0x428   :  { %1773 = vsyncpa [#allocation3], 1 }
 0x429   :  { %1774 = vsyncpa [#allocation5], 1 }

</bundles_post_ra>
